<compile_context>
chip_gen: v7x
topology: tpu7x:2x2x1
jax: 0.10.0
libtpu: 0.0.40
codegen_flags: <defaults>
</compile_context>

<pallas_src>
import functools

import jax
import jax.numpy as jnp
import numpy as np
from jax import lax
from jax.experimental import pallas as pl
from jax.experimental.pallas import tpu as pltpu


# ----------------------------------------------------------------- kernel ----

def _decoder_block_kernel(x_ref, xh_ref, w1_ref, c1_ref, wd_ref, c2_ref,
                          w3_ref, c3_ref, o_ref, x1_scr, *, tile_h, img_w):
    th, W = tile_h, img_w
    f4 = wd_ref.shape[1]
    f = f4 // 4
    cin = x_ref.shape[-1]

    # ---- stage 1: conv1(1x1) + BN1 + ReLU into a haloed VMEM scratch --------
    a_main = jnp.dot(x_ref[0].reshape(th * W, cin), w1_ref[...],
                     preferred_element_type=jnp.float32)
    x1_main = jnp.maximum(a_main + c1_ref[...], 0.0)
    x1_scr[0:th, 0:W, :] = x1_main.reshape(th, W, f).astype(x1_scr.dtype)

    a_halo = jnp.dot(xh_ref[0].reshape(W, cin), w1_ref[...],
                     preferred_element_type=jnp.float32)
    x1_halo = jnp.maximum(a_halo + c1_ref[...], 0.0)
    # Past the image bottom the halo row must be the zero-pad of x1 (not x).
    is_last = pl.program_id(1) == pl.num_programs(1) - 1
    x1_halo = jnp.where(is_last, 0.0, x1_halo)
    x1_scr[th:th + 1, 0:W, :] = x1_halo.reshape(1, W, f).astype(x1_scr.dtype)

    # Right-edge zero column (zero-pad of x1 on the image's right border).
    x1_scr[:, W:W + 1, :] = jnp.zeros((th + 1, 1, f), x1_scr.dtype)

    # ---- stage 2: ConvTranspose2d(3x3, s=2) as 4 parity sub-convs + BN2 + ReLU
    acc = None
    for s, (dy, dx) in enumerate(((0, 0), (0, 1), (1, 0), (1, 1))):
        p = x1_scr[dy:dy + th, dx:dx + W, :].reshape(th * W, f)
        d = jnp.dot(p, wd_ref[s * f:(s + 1) * f, :],
                    preferred_element_type=jnp.float32)
        acc = d if acc is None else acc + d
    z = jnp.maximum(acc + c2_ref[...], 0.0)

    # ---- stage 3: conv3(1x1) applied per parity (block-diag) + BN3 + ReLU ----
    y = jnp.dot(z.astype(w3_ref.dtype), w3_ref[...],
                preferred_element_type=jnp.float32)
    y = jnp.maximum(y + c3_ref[...], 0.0)
    o_ref[...] = y.reshape(1, th, W, f4).astype(o_ref.dtype)


# ---------------------------------------------------------------- wrapper ----

def _pick_tile_h(h, w, n, target_rows=1024):
    th = max(1, min(h, target_rows // max(w, 1)))
    while h % th:
        th -= 1
    # Keep >= 2 total grid steps so both v7x TensorCores get work.
    if n * (h // th) < 2 and th > 1:
        th = max(1, th // 2)
        while h % th:
            th -= 1
    return th


def decoder_block_forward(x_nchw, kp, *, tile_h=None):
    n, cin, h, w = x_nchw.shape
    f = kp["w1"].shape[1]
    if tile_h is None:
        tile_h = _pick_tile_h(h, w, n)
    assert h % tile_h == 0, "tile_h must divide H"
    n_tiles = h // tile_h

    # NCHW -> NHWC, cast to bf16 during the relayout (halves the write side).
    x = jnp.transpose(x_nchw, (0, 2, 3, 1)).astype(jnp.bfloat16)

    kernel = functools.partial(_decoder_block_kernel, tile_h=tile_h, img_w=w)
    const = lambda b, i: (0, 0)
    out = pl.pallas_call(
        kernel,
        out_shape=jax.ShapeDtypeStruct((n, h, w, 4 * f), jnp.bfloat16),
        grid=(n, n_tiles),
        in_specs=[
            # main row tile of x
            pl.BlockSpec((1, tile_h, w, cin), lambda b, i: (b, i, 0, 0)),
            # single halo row of x (clamped at the image bottom; masked in-kernel)
            pl.BlockSpec((1, 1, w, cin),
                         lambda b, i, _t=tile_h, _h=h:
                             (b, jnp.minimum((i + 1) * _t, _h - 1), 0, 0)),
            pl.BlockSpec((cin, f), const),          # w1 (BN1 folded)
            pl.BlockSpec((1, f), const),            # c1
            pl.BlockSpec((4 * f, 4 * f), const),    # wd (parity-packed, BN2 folded)
            pl.BlockSpec((1, 4 * f), const),        # c2
            pl.BlockSpec((4 * f, 4 * f), const),    # w3 block-diag (BN3 folded)
            pl.BlockSpec((1, 4 * f), const),        # c3
        ],
        out_specs=pl.BlockSpec((1, tile_h, w, 4 * f), lambda b, i: (b, i, 0, 0)),
        scratch_shapes=[pltpu.VMEM((tile_h + 1, w + 1, f), jnp.bfloat16)],
        compiler_params=pltpu.CompilerParams(
            dimension_semantics=("parallel", "parallel")),
    )(x, x, kp["w1"], kp["c1"], kp["wd"], kp["c2"], kp["w3"], kp["c3"])

    # Parity planes (n, h, w, py, px, f) -> NCHW (n, f, 2h, 2w): single
    # combined XLA transpose (+f32 cast) on the bf16 tensor.
    out = out.reshape(n, h, w, 2, 2, f)
    out = jnp.transpose(out, (0, 5, 1, 3, 2, 4)).reshape(n, f, 2 * h, 2 * w)
    return out.astype(jnp.float32)


# ----------------------------------------------------------- params / ref ----

def init_raw_params(key, cin, f):
    ks = jax.random.split(key, 12)

    def bn_params(k):
        k1, k2, k3, k4 = jax.random.split(k, 4)
        return dict(gamma=1.0 + 0.1 * jax.random.normal(k1, (f,)),
                    beta=0.1 * jax.random.normal(k2, (f,)),
                    mean=0.1 * jax.random.normal(k3, (f,)),
                    var=1.0 + 0.1 * jax.random.uniform(k4, (f,)))

    return dict(
        w1=0.1 * jax.random.normal(ks[0], (f, cin)),        # conv1.weight (F, Cin)
        b1=0.1 * jax.random.normal(ks[1], (f,)),
        bn1=bn_params(ks[2]),
        wt2=0.1 * jax.random.normal(ks[3], (f, f, 3, 3)),   # deconv2.weight (Cin=F, Cout=F, 3, 3)
        b2=0.1 * jax.random.normal(ks[4], (f,)),
        bn2=bn_params(ks[5]),
        w3=0.1 * jax.random.normal(ks[6], (f, f)),          # conv3.weight (F, F)
        b3=0.1 * jax.random.normal(ks[7], (f,)),
        bn3=bn_params(ks[8]),
    )


def pack_params(raw, eps=1e-5):
    """Fold bias + inference-mode BN into the matmul weights / shifts."""
    f = raw["b1"].shape[0]

    def fold(p):
        s = p["gamma"] / jnp.sqrt(p["var"] + eps)
        return s, p["beta"] - p["mean"] * s

    s1, sh1 = fold(raw["bn1"])
    s2, sh2 = fold(raw["bn2"])
    s3, sh3 = fold(raw["bn3"])

    # conv1 (1x1): (Cin, F), BN1 scale folded into output columns
    w1 = raw["w1"].T * s1[None, :]
    c1 = (raw["b1"] * s1 + sh1)[None, :]

    # ConvTranspose2d(3x3, stride 2, pad 1, output_padding 1) decomposed into
    # 4 output parities.  out[2m+py, 2l+px] uses x1[m+dy, l+dx] with the taps:
    #   parity q = 2*py+px, shift s indexes (dy,dx) in [(0,0),(0,1),(1,0),(1,1)]
    taps = {0: [(0, 1, 1)],
            1: [(0, 1, 2), (1, 1, 0)],
            2: [(0, 2, 1), (2, 0, 1)],
            3: [(0, 2, 2), (1, 2, 0), (2, 0, 2), (3, 0, 0)]}
    wt2 = np.asarray(raw["wt2"], np.float32)                 # (ci, co, ky, kx)
    wd = np.zeros((4 * f, 4 * f), np.float32)
    for q, lst in taps.items():
        for (s, ky, kx) in lst:
            wd[s * f:(s + 1) * f, q * f:(q + 1) * f] = wt2[:, :, ky, kx]
    wd = jnp.asarray(wd) * jnp.tile(s2, 4)[None, :]          # fold BN2 scale
    c2 = jnp.tile(raw["b2"] * s2 + sh2, 4)[None, :]

    # conv3 (1x1) applied per parity block -> block-diagonal (4F, 4F), BN3 folded
    w3 = raw["w3"].T * s3[None, :]
    w3blk = jnp.kron(jnp.eye(4, dtype=jnp.float32), w3)
    c3 = jnp.tile(raw["b3"] * s3 + sh3, 4)[None, :]

    return dict(w1=w1.astype(jnp.bfloat16), c1=c1.astype(jnp.float32),
                wd=wd.astype(jnp.bfloat16), c2=c2.astype(jnp.float32),
                w3=w3blk.astype(jnp.bfloat16), c3=c3.astype(jnp.float32))


def ref_forward(x_nchw, raw, eps=1e-5):
    """Pure-JAX f32 reference using the raw (unfolded) parameters."""
    x = jnp.transpose(x_nchw, (0, 2, 3, 1))  # NHWC

    def bn(y, p):
        return (y - p["mean"]) / jnp.sqrt(p["var"] + eps) * p["gamma"] + p["beta"]

    y = jnp.einsum("nhwc,fc->nhwf", x, raw["w1"],
                   precision=lax.Precision.HIGHEST) + raw["b1"]
    y = jnp.maximum(bn(y, raw["bn1"]), 0.0)

    # ConvTranspose2d == lhs-dilated regular conv with flipped, transposed kernel
    w_hwio = jnp.transpose(raw["wt2"][:, :, ::-1, ::-1], (2, 3, 0, 1))
    y = lax.conv_general_dilated(
        y, w_hwio, window_strides=(1, 1), padding=((1, 2), (1, 2)),
        lhs_dilation=(2, 2), dimension_numbers=("NHWC", "HWIO", "NHWC"),
        precision=lax.Precision.HIGHEST) + raw["b2"]
    y = jnp.maximum(bn(y, raw["bn2"]), 0.0)

    y = jnp.einsum("nhwf,gf->nhwg", y, raw["w3"],
                   precision=lax.Precision.HIGHEST) + raw["b3"]
    y = jnp.maximum(bn(y, raw["bn3"]), 0.0)
    return jnp.transpose(y, (0, 3, 1, 2))


# ------------------------------------------------------------------- main ----

if __name__ == "__main__":
    cin, f = 16, 32                 # 4*f = 128 -> lane-dense fused output block
    n, h, w = 2, 16, 16

    key = jax.random.PRNGKey(0)
    pkey, xkey = jax.random.split(key)
    raw = init_raw_params(pkey, cin, f)
    kp = pack_params(raw)
    x = jax.random.normal(xkey, (n, cin, h, w), jnp.float32)

    # tile_h=8 -> grid (2, 2): exercises both the valid-halo and the
    # image-bottom (masked) halo paths, and keeps >= 2 parallel grid steps.
    fwd = jax.jit(functools.partial(decoder_block_forward, tile_h=8))
    out = jax.block_until_ready(fwd(x, kp))
    ref = jax.block_until_ready(ref_forward(x, raw))

    assert out.shape == (n, f, 2 * h, 2 * w)
    # bf16 matmul operands / bf16 kernel output (f32 accumulate) vs f32 reference
    np.testing.assert_allclose(np.asarray(out), np.asarray(ref),
                               rtol=2e-2, atol=2e-2)
    print("KERNEL_OK")
</pallas_src>

<mosaic_0001>
module attributes {stable_mosaic.version = 11 : i64} {
  func.func @_decoder_block_kernel(%arg0: i32, %arg1: i32, %arg2: memref<1x8x16x16xbf16, #tpu.memory_space<vmem>>, %arg3: memref<1x1x16x16xbf16, #tpu.memory_space<vmem>>, %arg4: memref<16x32xbf16, #tpu.memory_space<vmem>>, %arg5: memref<1x32xf32, #tpu.memory_space<vmem>>, %arg6: memref<128x128xbf16, #tpu.memory_space<vmem>>, %arg7: memref<1x128xf32, #tpu.memory_space<vmem>>, %arg8: memref<128x128xbf16, #tpu.memory_space<vmem>>, %arg9: memref<1x128xf32, #tpu.memory_space<vmem>>, %arg10: memref<1x8x16x128xbf16, #tpu.memory_space<vmem>>, %arg11: memref<9x17x32xbf16, #tpu.memory_space<vmem>>) attributes {dimension_semantics = [#tpu.dimension_semantics<parallel>, #tpu.dimension_semantics<parallel>], iteration_bounds = array<i64: 2, 2>, scalar_prefetch = 0 : i64, scratch_operands = 1 : i64, tpu.core_type = #tpu.core_type<tc>, window_params = [{transform_indices = @transform_0, window_bounds = array<i64: 1, 8, 16, 16>}, {transform_indices = @transform_1, window_bounds = array<i64: 1, 1, 16, 16>}, {pipeline_mode = #tpu.pipeline_mode<synchronous>, transform_indices = @transform_2, window_bounds = array<i64: 16, 32>}, {pipeline_mode = #tpu.pipeline_mode<synchronous>, transform_indices = @transform_3, window_bounds = array<i64: 1, 32>}, {pipeline_mode = #tpu.pipeline_mode<synchronous>, transform_indices = @transform_4, window_bounds = array<i64: 128, 128>}, {pipeline_mode = #tpu.pipeline_mode<synchronous>, transform_indices = @transform_5, window_bounds = array<i64: 1, 128>}, {pipeline_mode = #tpu.pipeline_mode<synchronous>, transform_indices = @transform_6, window_bounds = array<i64: 128, 128>}, {pipeline_mode = #tpu.pipeline_mode<synchronous>, transform_indices = @transform_7, window_bounds = array<i64: 1, 128>}, {transform_indices = @transform_8, window_bounds = array<i64: 1, 8, 16, 128>}]} {
    %c0 = arith.constant 0 : index
    %c0_0 = arith.constant 0 : index
    %c0_1 = arith.constant 0 : index
    %c0_2 = arith.constant 0 : index
    %0 = vector.load %arg2[%c0, %c0_0, %c0_1, %c0_2] : memref<1x8x16x16xbf16, #tpu.memory_space<vmem>>, vector<1x8x16x16xbf16>
    %1 = vector.shape_cast %0 : vector<1x8x16x16xbf16> to vector<8x16x16xbf16>
    %2 = vector.shape_cast %1 : vector<8x16x16xbf16> to vector<128x16xbf16>
    %c0_3 = arith.constant 0 : index
    %c0_4 = arith.constant 0 : index
    %3 = vector.load %arg4[%c0_3, %c0_4] : memref<16x32xbf16, #tpu.memory_space<vmem>>, vector<16x32xbf16>
    %cst = arith.constant dense<0.000000e+00> : vector<128x32xf32>
    %4 = tpu.matmul %2, %3, %cst {dimension_numbers = #tpu.dot_dimension_numbers<[1], [0], [0], [1], [0, 0, 1, 1], [], []>} : vector<128x16xbf16>, vector<16x32xbf16>, vector<128x32xf32> -> vector<128x32xf32>
    %c0_5 = arith.constant 0 : index
    %c0_6 = arith.constant 0 : index
    %5 = vector.load %arg5[%c0_5, %c0_6] : memref<1x32xf32, #tpu.memory_space<vmem>>, vector<1x32xf32>
    %6 = vector.broadcast %5 : vector<1x32xf32> to vector<128x32xf32>
    %7 = arith.addf %4, %6 : vector<128x32xf32>
    %cst_7 = arith.constant 0.000000e+00 : f32
    %8 = vector.broadcast %cst_7 : f32 to vector<128x32xf32>
    %9 = arith.maximumf %7, %8 : vector<128x32xf32>
    %10 = vector.shape_cast %9 : vector<128x32xf32> to vector<8x16x32xf32>
    %11 = arith.truncf %10 : vector<8x16x32xf32> to vector<8x16x32xbf16>
    %c0_8 = arith.constant 0 : index
    %c0_9 = arith.constant 0 : index
    %c0_10 = arith.constant 0 : index
    %12 = vector.load %arg11[%c0_8, %c0_9, %c0_10] : memref<9x17x32xbf16, #tpu.memory_space<vmem>>, vector<8x16x32xbf16>
    tpu.vector_store %arg11[%c0_8, %c0_9, %c0_10], %11 {strides = array<i32>} : memref<9x17x32xbf16, #tpu.memory_space<vmem>>, vector<8x16x32xbf16>,
    %c0_11 = arith.constant 0 : index
    %c0_12 = arith.constant 0 : index
    %c0_13 = arith.constant 0 : index
    %c0_14 = arith.constant 0 : index
    %13 = vector.load %arg3[%c0_11, %c0_12, %c0_13, %c0_14] : memref<1x1x16x16xbf16, #tpu.memory_space<vmem>>, vector<1x1x16x16xbf16>
    %14 = vector.shape_cast %13 : vector<1x1x16x16xbf16> to vector<1x16x16xbf16>
    %15 = vector.shape_cast %14 : vector<1x16x16xbf16> to vector<16x16xbf16>
    %c0_15 = arith.constant 0 : index
    %c0_16 = arith.constant 0 : index
    %16 = vector.load %arg4[%c0_15, %c0_16] : memref<16x32xbf16, #tpu.memory_space<vmem>>, vector<16x32xbf16>
    %cst_17 = arith.constant dense<0.000000e+00> : vector<16x32xf32>
    %17 = tpu.matmul %15, %16, %cst_17 {dimension_numbers = #tpu.dot_dimension_numbers<[1], [0], [0], [1], [0, 0, 1, 1], [], []>} : vector<16x16xbf16>, vector<16x32xbf16>, vector<16x32xf32> -> vector<16x32xf32>
    %c0_18 = arith.constant 0 : index
    %c0_19 = arith.constant 0 : index
    %18 = vector.load %arg5[%c0_18, %c0_19] : memref<1x32xf32, #tpu.memory_space<vmem>>, vector<1x32xf32>
    %19 = vector.broadcast %18 : vector<1x32xf32> to vector<16x32xf32>
    %20 = arith.addf %17, %19 : vector<16x32xf32>
    %cst_20 = arith.constant 0.000000e+00 : f32
    %21 = vector.broadcast %cst_20 : f32 to vector<16x32xf32>
    %22 = arith.maximumf %20, %21 : vector<16x32xf32>
    %c1_i32 = arith.constant 1 : i32
    %23 = arith.cmpi eq, %arg1, %c1_i32 : i32
    %cst_21 = arith.constant 0.000000e+00 : f32
    %24 = vector.broadcast %cst_21 : f32 to vector<16x32xf32>
    %25 = arith.select %23, %24, %22 : vector<16x32xf32>
    %26 = vector.shape_cast %25 : vector<16x32xf32> to vector<1x16x32xf32>
    %27 = arith.truncf %26 : vector<1x16x32xf32> to vector<1x16x32xbf16>
    %c8 = arith.constant 8 : index
    %c0_22 = arith.constant 0 : index
    %c0_23 = arith.constant 0 : index
    %28 = vector.load %arg11[%c8, %c0_22, %c0_23] : memref<9x17x32xbf16, #tpu.memory_space<vmem>>, vector<1x16x32xbf16>
    tpu.vector_store %arg11[%c8, %c0_22, %c0_23], %27 {strides = array<i32>} : memref<9x17x32xbf16, #tpu.memory_space<vmem>>, vector<1x16x32xbf16>,
    %cst_24 = arith.constant 0.000000e+00 : bf16
    %29 = vector.broadcast %cst_24 : bf16 to vector<9x1x32xbf16>
    %c0_25 = arith.constant 0 : index
    %c16 = arith.constant 16 : index
    %c0_26 = arith.constant 0 : index
    %30 = vector.load %arg11[%c0_25, %c16, %c0_26] : memref<9x17x32xbf16, #tpu.memory_space<vmem>>, vector<9x1x32xbf16>
    tpu.vector_store %arg11[%c0_25, %c16, %c0_26], %29 {strides = array<i32>} : memref<9x17x32xbf16, #tpu.memory_space<vmem>>, vector<9x1x32xbf16>,
    %c0_27 = arith.constant 0 : index
    %c0_28 = arith.constant 0 : index
    %c0_29 = arith.constant 0 : index
    %31 = vector.load %arg11[%c0_27, %c0_28, %c0_29] : memref<9x17x32xbf16, #tpu.memory_space<vmem>>, vector<8x16x32xbf16>
    %32 = vector.shape_cast %31 : vector<8x16x32xbf16> to vector<128x32xbf16>
    %c0_30 = arith.constant 0 : index
    %c0_31 = arith.constant 0 : index
    %33 = vector.load %arg6[%c0_30, %c0_31] : memref<128x128xbf16, #tpu.memory_space<vmem>>, vector<32x128xbf16>
    %cst_32 = arith.constant dense<0.000000e+00> : vector<128x128xf32>
    %34 = tpu.matmul %32, %33, %cst_32 {dimension_numbers = #tpu.dot_dimension_numbers<[1], [0], [0], [1], [0, 0, 1, 1], [], []>} : vector<128x32xbf16>, vector<32x128xbf16>, vector<128x128xf32> -> vector<128x128xf32>
    %c0_33 = arith.constant 0 : index
    %c1 = arith.constant 1 : index
    %c0_34 = arith.constant 0 : index
    %35 = vector.load %arg11[%c0_33, %c1, %c0_34] : memref<9x17x32xbf16, #tpu.memory_space<vmem>>, vector<8x16x32xbf16>
    %36 = vector.shape_cast %35 : vector<8x16x32xbf16> to vector<128x32xbf16>
    %c32 = arith.constant 32 : index
    %c0_35 = arith.constant 0 : index
    %37 = vector.load %arg6[%c32, %c0_35] : memref<128x128xbf16, #tpu.memory_space<vmem>>, vector<32x128xbf16>
    %cst_36 = arith.constant dense<0.000000e+00> : vector<128x128xf32>
    %38 = tpu.matmul %36, %37, %cst_36 {dimension_numbers = #tpu.dot_dimension_numbers<[1], [0], [0], [1], [0, 0, 1, 1], [], []>} : vector<128x32xbf16>, vector<32x128xbf16>, vector<128x128xf32> -> vector<128x128xf32>
    %39 = arith.addf %34, %38 : vector<128x128xf32>
    %c1_37 = arith.constant 1 : index
    %c0_38 = arith.constant 0 : index
    %c0_39 = arith.constant 0 : index
    %40 = vector.load %arg11[%c1_37, %c0_38, %c0_39] : memref<9x17x32xbf16, #tpu.memory_space<vmem>>, vector<8x16x32xbf16>
    %41 = vector.shape_cast %40 : vector<8x16x32xbf16> to vector<128x32xbf16>
    %c64 = arith.constant 64 : index
    %c0_40 = arith.constant 0 : index
    %42 = vector.load %arg6[%c64, %c0_40] : memref<128x128xbf16, #tpu.memory_space<vmem>>, vector<32x128xbf16>
    %cst_41 = arith.constant dense<0.000000e+00> : vector<128x128xf32>
    %43 = tpu.matmul %41, %42, %cst_41 {dimension_numbers = #tpu.dot_dimension_numbers<[1], [0], [0], [1], [0, 0, 1, 1], [], []>} : vector<128x32xbf16>, vector<32x128xbf16>, vector<128x128xf32> -> vector<128x128xf32>
    %44 = arith.addf %39, %43 : vector<128x128xf32>
    %c1_42 = arith.constant 1 : index
    %c1_43 = arith.constant 1 : index
    %c0_44 = arith.constant 0 : index
    %45 = vector.load %arg11[%c1_42, %c1_43, %c0_44] : memref<9x17x32xbf16, #tpu.memory_space<vmem>>, vector<8x16x32xbf16>
    %46 = vector.shape_cast %45 : vector<8x16x32xbf16> to vector<128x32xbf16>
    %c96 = arith.constant 96 : index
    %c0_45 = arith.constant 0 : index
    %47 = vector.load %arg6[%c96, %c0_45] : memref<128x128xbf16, #tpu.memory_space<vmem>>, vector<32x128xbf16>
    %cst_46 = arith.constant dense<0.000000e+00> : vector<128x128xf32>
    %48 = tpu.matmul %46, %47, %cst_46 {dimension_numbers = #tpu.dot_dimension_numbers<[1], [0], [0], [1], [0, 0, 1, 1], [], []>} : vector<128x32xbf16>, vector<32x128xbf16>, vector<128x128xf32> -> vector<128x128xf32>
    %49 = arith.addf %44, %48 : vector<128x128xf32>
    %c0_47 = arith.constant 0 : index
    %c0_48 = arith.constant 0 : index
    %50 = vector.load %arg7[%c0_47, %c0_48] : memref<1x128xf32, #tpu.memory_space<vmem>>, vector<1x128xf32>
    %51 = vector.broadcast %50 : vector<1x128xf32> to vector<128x128xf32>
    %52 = arith.addf %49, %51 : vector<128x128xf32>
    %cst_49 = arith.constant 0.000000e+00 : f32
    %53 = vector.broadcast %cst_49 : f32 to vector<128x128xf32>
    %54 = arith.maximumf %52, %53 : vector<128x128xf32>
    %55 = arith.truncf %54 : vector<128x128xf32> to vector<128x128xbf16>
    %c0_50 = arith.constant 0 : index
    %c0_51 = arith.constant 0 : index
    %56 = vector.load %arg8[%c0_50, %c0_51] : memref<128x128xbf16, #tpu.memory_space<vmem>>, vector<128x128xbf16>
    %cst_52 = arith.constant dense<0.000000e+00> : vector<128x128xf32>
    %57 = tpu.matmul %55, %56, %cst_52 {dimension_numbers = #tpu.dot_dimension_numbers<[1], [0], [0], [1], [0, 0, 1, 1], [], []>} : vector<128x128xbf16>, vector<128x128xbf16>, vector<128x128xf32> -> vector<128x128xf32>
    %c0_53 = arith.constant 0 : index
    %c0_54 = arith.constant 0 : index
    %58 = vector.load %arg9[%c0_53, %c0_54] : memref<1x128xf32, #tpu.memory_space<vmem>>, vector<1x128xf32>
    %59 = vector.broadcast %58 : vector<1x128xf32> to vector<128x128xf32>
    %60 = arith.addf %57, %59 : vector<128x128xf32>
    %cst_55 = arith.constant 0.000000e+00 : f32
    %61 = vector.broadcast %cst_55 : f32 to vector<128x128xf32>
    %62 = arith.maximumf %60, %61 : vector<128x128xf32>
    %63 = vector.shape_cast %62 : vector<128x128xf32> to vector<1x8x16x128xf32>
    %64 = arith.truncf %63 : vector<1x8x16x128xf32> to vector<1x8x16x128xbf16>
    %c0_56 = arith.constant 0 : index
    %c0_57 = arith.constant 0 : index
    %c0_58 = arith.constant 0 : index
    %c0_59 = arith.constant 0 : index
    %65 = vector.load %arg10[%c0_56, %c0_57, %c0_58, %c0_59] : memref<1x8x16x128xbf16, #tpu.memory_space<vmem>>, vector<1x8x16x128xbf16>
    tpu.vector_store %arg10[%c0_56, %c0_57, %c0_58, %c0_59], %64 {strides = array<i32>} : memref<1x8x16x128xbf16, #tpu.memory_space<vmem>>, vector<1x8x16x128xbf16>,
    return
  }
  func.func @transform_0(%arg0: i32, %arg1: i32) -> (i32, i32, i32, i32) {
    %c0_i32 = arith.constant 0 : i32
    %c0_i32_0 = arith.constant 0 : i32
    %c0_i32_1 = arith.constant 0 : i32
    return %arg0, %arg1, %c0_i32, %c0_i32_0 : i32, i32, i32, i32
  }
  func.func @transform_1(%arg0: i32, %arg1: i32) -> (i32, i32, i32, i32) {
    %c1_i32 = arith.constant 1 : i32
    %0 = arith.addi %arg1, %c1_i32 : i32
    %c8_i32 = arith.constant 8 : i32
    %1 = arith.muli %0, %c8_i32 : i32
    %c15_i32 = arith.constant 15 : i32
    %2 = arith.minsi %1, %c15_i32 : i32
    %c0_i32 = arith.constant 0 : i32
    %c0_i32_0 = arith.constant 0 : i32
    %c0_i32_1 = arith.constant 0 : i32
    return %arg0, %2, %c0_i32, %c0_i32_0 : i32, i32, i32, i32
  }
  func.func @transform_2(%arg0: i32, %arg1: i32) -> (i32, i32) {
    %c0_i32 = arith.constant 0 : i32
    %c0_i32_0 = arith.constant 0 : i32
    %c0_i32_1 = arith.constant 0 : i32
    return %c0_i32, %c0_i32_0 : i32, i32
  }
  func.func @transform_3(%arg0: i32, %arg1: i32) -> (i32, i32) {
    %c0_i32 = arith.constant 0 : i32
    %c0_i32_0 = arith.constant 0 : i32
    %c0_i32_1 = arith.constant 0 : i32
    return %c0_i32, %c0_i32_0 : i32, i32
  }
  func.func @transform_4(%arg0: i32, %arg1: i32) -> (i32, i32) {
    %c0_i32 = arith.constant 0 : i32
    %c0_i32_0 = arith.constant 0 : i32
    %c0_i32_1 = arith.constant 0 : i32
    return %c0_i32, %c0_i32_0 : i32, i32
  }
  func.func @transform_5(%arg0: i32, %arg1: i32) -> (i32, i32) {
    %c0_i32 = arith.constant 0 : i32
    %c0_i32_0 = arith.constant 0 : i32
    %c0_i32_1 = arith.constant 0 : i32
    return %c0_i32, %c0_i32_0 : i32, i32
  }
  func.func @transform_6(%arg0: i32, %arg1: i32) -> (i32, i32) {
    %c0_i32 = arith.constant 0 : i32
    %c0_i32_0 = arith.constant 0 : i32
    %c0_i32_1 = arith.constant 0 : i32
    return %c0_i32, %c0_i32_0 : i32, i32
  }
  func.func @transform_7(%arg0: i32, %arg1: i32) -> (i32, i32) {
    %c0_i32 = arith.constant 0 : i32
    %c0_i32_0 = arith.constant 0 : i32
    %c0_i32_1 = arith.constant 0 : i32
    return %c0_i32, %c0_i32_0 : i32, i32
  }
  func.func @transform_8(%arg0: i32, %arg1: i32) -> (i32, i32, i32, i32) {
    %c0_i32 = arith.constant 0 : i32
    %c0_i32_0 = arith.constant 0 : i32
    %c0_i32_1 = arith.constant 0 : i32
    return %arg0, %arg1, %c0_i32, %c0_i32_0 : i32, i32, i32, i32
  }
}

</mosaic_0001>

<bundles_post_ra>
// kernel: decoder_block_forward.1
= control target key start
LH: loop header
LB: loop body
LE: loop exit
PB: predicated region body
PF: predicated region fallthrough
CT: control target
= control target key end

     0   :  { %s3082_s27 = smov 0   ;;  %s3084_s28 = smov 0   ;;  %s3513_s0 = inlined_call_operand.vmem [shape: bf16[2,16,16,16], index: 0, kind: input, shape index: {}, may-alias: {0,1}]   ;;  %s3514_s1 = inlined_call_operand.vmem [shape: bf16[2,16,16,16], index: 1, kind: input, shape index: {}, may-alias: {0,1}]   ;;  %s3515_s2 = inlined_call_operand.vmem [shape: bf16[16,32], index: 2, kind: input, shape index: {}]   ;;  %s3516_s3 = inlined_call_operand.vmem [shape: f32[1,32], index: 3, kind: input, shape index: {}]   ;;  %s3517_s4 = inlined_call_operand.vmem [shape: bf16[128,128], index: 4, kind: input, shape index: {}]   ;;  %s3518_s5 = inlined_call_operand.vmem [shape: f32[1,128], index: 5, kind: input, shape index: {}]   ;;  %s3519_s6 = inlined_call_operand.vmem [shape: bf16[128,128], index: 6, kind: input, shape index: {}]   ;;  %s3520_s7 = inlined_call_operand.vmem [shape: f32[1,128], index: 7, kind: input, shape index: {}]   ;;  %s3521_s8 = inlined_call_operand.vmem [shape: bf16[2,16,16,128], index: 8, kind: output, shape index: {}]  }
   0x1   :  { %s3086_s29 = smov 0   ;;  %s3088_s30 = smov 0  }
   0x2   :  { %s3090_s9 = smov 0  }
   0x3 LB: > { %s27_s10 = sadd.s32 1, %s3025_s29  ;;  %s30_s11 = sadd.s32 1, %s3029_s30  ;;  %s3033_s9 = sphi %s3090_s9, %s18_s9   ;;  %s3029_s30 = sphi %s3088_s30, %s3531_s30   ;;  %s3025_s29 = sphi %s3086_s29, %s3530_s29   ;;  %s3021_s28 = sphi %s3084_s28, %s3529_s28   ;;  %s3017_s27 = sphi %s3082_s27, %s3528_s27  }
   0x4   : > { %p28_p0 = scmp.ge.s32.totalorder %s27_s10, 2  ;;  %p2416_p1 = scmp.ge.s32.totalorder %s3033_s9, 1 }
   0x5   : > { %p316_p2 = scmp.lt.s32.totalorder %s3033_s9, 5 }
   0x6   : > { %s3533_s10 = smov (%p28_p0, %s27_s10), 0  ;;  %s3535_s11 = smov (!%p28_p0, %s30_s11), %s3029_s30 }
   0x7   : > { %p317_p3 = pnand %p2416_p1, %p316_p2  ;;  %p32_p4 = scmp.ge.s32.totalorder %s3535_s11, 2 }
   0x8   : > { %v2952_v0 = vld [vmem:[%s3515_s2] sm:$0xff] (!%p317_p3)   ;;  %s2417_s14 = sshll.u32 (!%p317_p3), %s3017_s27, 3  ;;  %p374_p5 = scmp.lt.s32.totalorder (!%p317_p3), %s3021_s28, 1  ;;  %v3035_v1 = vmov (!%p317_p3), 0.0   ;;  %vm3036_vm0 = vmmov (!%p317_p3), 0   ;;  %vm484_vm1 = vcmask (!%p317_p3), 130048  }
   0x9   : > { %s3537_s11 = smov (%p32_p4, %s3535_s11), 0  ;;  %320 = sbr.rel (%p317_p3) target bundleno = 794 (0x31a), region = 52 }
   0xa   : > { %p376_p6 = scmp.lt.s32.totalorder (!%p317_p3), %s2417_s14, 15  ;;  %2726 = vmatprep.subr.bf16.mxu0 (!%p317_p3), %v2952_v0  ;;  %2744 = vmatprep.subr.bf16.mxu1 (!%p317_p3), %v3035_v1  ;;  %v2961_v2 = vld [vmem:[%s3515_s2] sm:$0xff] (!%p317_p3)   ;;  %s2577_s17 = sadd.s32 (!%p317_p3), 8, %s2417_s14  ;;  %v2964_v13 = vld [vmem:[%s3517_s4 + $0x8] sm:$0xff] (!%p317_p3)   ;;  %vm788_vm2 = vcmask (!%p317_p3), 253952   ;;  %v2968_v20 = vld [vmem:[%s3517_s4 + $0x10] sm:$0xff] (!%p317_p3)  }
   0xb   : > { %2727 = vmatpush3.bf16.msra.mxu0 (!%p317_p3), %v2952_v0  ;;  %2746 = vmatprep.mubr.msk.bf16.mxu1 (!%p317_p3), %vm3036_vm0, %v3035_v1  ;;  %p386_p7 = scmp.lt.s32.totalorder (!%p317_p3), %s2577_s17, 15  ;;  %v2963_v12 = vld [vmem:[%s3517_s4] sm:$0xff] (!%p317_p3)   ;;  %vm789_vm3 = vsmask.f32 (!%p317_p3), 256  ;;  %v791_v15 = vld [vmem:[#allocation2 + $0x8] sm:$0x1] (!%p317_p3) }
   0xc   : > { %2745 = vmatpush3.bf16.msra.mxu1 (!%p317_p3), %v2961_v2  ;;  %vm3147_vm4 = vmand (!%p317_p3), %vm788_vm2, %vm789_vm3  ;;  %v794_v17 = vld [vmem:[#allocation2 + $0x14] sm:$0x1] (!%p317_p3)  ;;  %v3158_v19 = vld [vmem:[%s3517_s4 + $0x20] sm:$0xff] (!%p317_p3)   ;;  %2750 = vmatprep.subr.bf16.mxu0 (!%p317_p3), %v2968_v20  ;;  %p771_p8 = scmp.eq.s32.totalorder (!%p317_p3), %s3017_s27, 1  ;;  %vm686_vm5 = vcmask (!%p317_p3), 257024   ;;  %vm1081_vm7 = vcmask (!%p317_p3), 261120  }
   0xd   : > { %2770 = vmatprep.subr.bf16.mxu1 (!%p317_p3), %v2963_v12  ;;  %v792_v16 = vsel (!%p317_p3), %vm3147_vm4, 0, %v791_v15  ;;  %v795_v18 = vsel (!%p317_p3), %vm3147_vm4, 0, %v794_v17  ;;  %v800_v21 = vld [vmem:[#allocation2 + $0x2c] sm:$0x1] (!%p317_p3)  ;;  %v2969_v22 = vld [vmem:[%s3517_s4 + $0x18] sm:$0xff] (!%p317_p3)  }
   0xe   : > { %793 = vst [vmem:[#allocation2 + $0x8] sm:$0x1] (!%p317_p3), %v792_v16  ;;  %796 = vst [vmem:[#allocation2 + $0x14] sm:$0x1] (!%p317_p3), %v795_v18  ;;  %v797_v23 = vld [vmem:[#allocation2 + $0x20] sm:$0x1] (!%p317_p3) }
   0xf   : > { %v801_v24 = vsel (!%p317_p3), %vm3147_vm4, 0, %v800_v21  ;;  %v798_v25 = vsel (!%p317_p3), %vm3147_vm4, 0, %v797_v23  ;;  %v806_v26 = vld [vmem:[#allocation2 + $0x44] sm:$0x1] (!%p317_p3)  ;;  %v803_v27 = vld [vmem:[#allocation2 + $0x38] sm:$0x1] (!%p317_p3) }
  0x10   : > { %s3539_s28 = smov (!%p374_p5, %s3021_s28), 1  ;;  %s3541_s14 = smov (!%p376_p6, %s2417_s14), 15  ;;  %802 = vst [vmem:[#allocation2 + $0x2c] sm:$0x1] %v801_v24  ;;  %799 = vst [vmem:[#allocation2 + $0x20] sm:$0x1] %v798_v25 }
  0x11   : > { %s2419_s18 = sshll.u32 %s3539_s28, 5  ;;  %s2418_s19 = sshll.u32 %s3541_s14, 1  ;;  %v807_v28 = vsel %vm3147_vm4, 0, %v806_v26  ;;  %v804_v29 = vsel %vm3147_vm4, 0, %v803_v27  ;;  %v812_v30 = vld [vmem:[#allocation2 + $0x5c] sm:$0x1] }
  0x12   : > { %s3121_s20 = sadd.s32 %s2419_s18, %s2418_s19  ;;  %s3543_s17 = smov (!%p386_p7, %s2577_s17), 15  ;;  %808 = vst [vmem:[#allocation2 + $0x44] sm:$0x1] %v807_v28  ;;  %805 = vst [vmem:[#allocation2 + $0x38] sm:$0x1] %v804_v29  ;;  %v813_v32 = vsel %vm3147_vm4, 0, %v812_v30 }
  0x13   : > { %s2420_s21 = sshll.u32 %s3121_s20, 2  ;;  %s3545_s17 = smov (!%p386_p7, %s3543_s17), 15  ;;  %v809_v31 = vld [vmem:[#allocation2 + $0x50] sm:$0x1]  ;;  %814 = vst [vmem:[#allocation2 + $0x5c] sm:$0x1] %v813_v32 }
  0x14   : > { %s382_s24 = scalar_lea.vmem %s3513_s0, %s2420_s21  ;;  %s2425_s25 = sshll.u32 %s3545_s17, 1  ;;  %v810_v33 = vsel %vm3147_vm4, 0, %v809_v31  ;;  %v815_v34 = vld [vmem:[#allocation2 + $0x68] sm:$0x1]  ;;  %v3184_v36 = vld [vmem:[%s3516_s3] ss:$0 sm:$0xff] }
  0x15   : > { %v2953_v3 = vld [vmem:[%s382_s24] sm:$0xff]   ;;  %v2954_v4 = vld [vmem:[%s382_s24 + $0x8] sm:$0xff]   ;;  %v2955_v5 = vld [vmem:[%s382_s24 + $0x10] sm:$0xff]   ;;  %s394_s26 = sadd.s32 %s2425_s25, %s2419_s18  ;;  %811 = vst [vmem:[#allocation2 + $0x50] sm:$0x1] %v810_v33  ;;  %v816_v35 = vsel %vm3147_vm4, 0, %v815_v34  ;;  %s3488_s12 = scalar_lea.vmem %s3521_s8, %s2420_s21 }
  0x16   : > { %2728 = vmatprep.mubr.msk.bf16.mxu0 %vm484_vm1, %v2953_v3  ;;  %v2956_v6 = vld [vmem:[%s382_s24 + $0x18] sm:$0xff]   ;;  %s2427_s28 = sshll.u32 %s394_s26, 2  ;;  %v2957_v7 = vld [vmem:[%s382_s24 + $0x20] sm:$0xff]   ;;  %v2958_v9 = vld [vmem:[%s382_s24 + $0x28] sm:$0xff]   ;;  %817 = vst [vmem:[#allocation2 + $0x68] sm:$0x1] %v816_v35 }
  0x17   : > { %2729 = vmatmul.mubr.msk.bf16.vlgmr.msra.gmra.mrb[0].mxu0 %vm484_vm1, %v2954_v4  ;;  %s396_s14 = scalar_lea.vmem %s3514_s1, %s2427_s28  ;;  %v2959_v10 = vld [vmem:[%s382_s24 + $0x30] sm:$0xff]   ;;  %v2960_v11 = vld [vmem:[%s382_s24 + $0x38] sm:$0xff]   ;;  %v838_v40 = vld [vmem:[#allocation2 + $0x8] sm:$0x1]  ;;  %vm846_vm8 = vsmask.f32 3328 }
  0x18   : > { %2732 = vmatprep.mubr.msk.bf16.mxu0 %vm484_vm1, %v2955_v5  ;;  %v2962_v8 = vld [vmem:[%s396_s14] sm:$0xff]   ;;  %2751 = vmatpush3.bf16.msra.mxu0 %v2968_v20  ;;  %v839_v41 = vld [vmem:[#allocation2 + $0x14] sm:$0x1]  ;;  %s3189_s13 = scalar_select %p771_p8, 1, 0  ;;  %v869_v51 = vshll.u32 %v838_v40, 16 }
  0x19   : > { %2747 = vmatmul.mubr.msk.bf16.vlgmr.msra.gmra.mrb[0].mxu1 %vm484_vm1, %v2962_v8  ;;  %2752 = vmatprep.subr.bf16.mxu0 %v2969_v22  ;;  %v840_v44 = vld [vmem:[#allocation2 + $0x20] sm:$0x1]  ;;  %v841_v48 = vld [vmem:[#allocation2 + $0x2c] sm:$0x1]  ;;  %v893_v52 = vshll.u32 %v839_v41, 16 }
  0x1a   : > { %2771 = vmatpush3.bf16.msra.mxu1 %v2963_v12  ;;  %v843_v53 = vld [vmem:[#allocation2 + $0x44] sm:$0x1]  ;;  %v917_v56 = vshll.u32 %v840_v44, 16  ;;  %v941_v59 = vshll.u32 %v841_v48, 16  ;;  %v842_v60 = vld [vmem:[#allocation2 + $0x38] sm:$0x1]  ;;  %v773_v61 = vstv %s3189_s13 }
  0x1b   : > { %2772 = vmatprep.subr.bf16.mxu1 %v2964_v13  ;;  %v989_v63 = vshll.u32 %v843_v53, 16  ;;  %v3196_v3 = vrot.slane %v869_v51, 5  ;;  %v3198_v4 = vrot.slane %v893_v52, 5  ;;  %vm3205_vm6 = vcmp.eq.s32.totalorder %v773_v61, 1 }
  0x1c   : > { %2753 = vmatpush3.bf16.msra.mxu0 %v2969_v22  ;;  %v3211_v16 = vrot.slane %v941_v59, 5  ;;  %vm847_vm9 = vsmask.f32 7440 }
  0x1d   : > { %v3215_v24 = vrot.slane %v989_v63, 5  ;;  %vm3276_vm10 = vmor %vm846_vm8, %vm847_vm9 }
  0x1e   : > { %2773 = vmatpush3.bf16.msra.mxu1 %v2964_v13 }
  0x1f   : > { %2733 = vmatmul.mubr.msk.bf16.gmra.mrb[4].mxu0 %vm484_vm1, %v2956_v6  ;;  %2790 = vmatprep.subr.bf16.mxu1 %v3158_v19 }
  0x20   : > { %2736 = vmatprep.mubr.msk.bf16.mxu0 %vm484_vm1, %v2957_v7  ;;  %v844_v7 = vld [vmem:[#allocation2 + $0x50] sm:$0x1] }
  0x21   : > { %v1013_v25 = vshll.u32 %v844_v7, 16 }
  0x27   : > { %2737 = vmatmul.mubr.msk.bf16.gmra.mrb[8].mxu0 %vm484_vm1, %v2958_v9 }
  0x28   : > { %2740 = vmatprep.mubr.msk.bf16.mxu0 %vm484_vm1, %v2959_v10  ;;  %v3203_v10 = vrot.slane %v917_v56, 5 }
  0x2f   : > { %2741 = vmatmul.mubr.msk.bf16.gmra.mrb[12].mxu0 %vm484_vm1, %v2960_v11  ;;  %v965_v11 = vshll.u32 %v842_v60, 16 }
  0x31   : > { %v3220_v32 = vrot.slane %v965_v11, 5 }
  0xea   : > { %v2730_v37 = vpop.f32.mrb[0].mxu0 }
  0xeb   : > { %v552_v38 = vadd.f32 %v2730_v37, %v3184_v36  ;;  %v543_v39 = vpop.f32.mrb[1].mxu0 }
  0xec   : > { %v544_v42 = vadd.f32 %v3184_v36, %v543_v39  ;;  %v2731_v43 = vpop.f32.mrb[2].mxu0  ;;  %v762_v0 = vpop.f32.mrb[0].mxu1 }
  0xed   : > { %v608_v45 = vmax.f32 %v552_v38, 0.0  ;;  %v555_v46 = vadd.f32 %v2731_v43, %v3184_v36  ;;  %v546_v47 = vpop.f32.mrb[3].mxu0  ;;  %v763_v5 = vadd.f32 %v3184_v36, %v762_v0  ;;  %v2748_v6 = vpop.f32.mrb[1].mxu1 }
  0xee   : > { %v606_v49 = vmax.f32 %v544_v42, 0.0  ;;  %v547_v50 = vadd.f32 %v3184_v36, %v546_v47  ;;  %v765_v13 = vpop.f32.mrb[2].mxu1 }
  0xef   : > { %v2580_v54 = vpack.c.bf16 %v608_v45, %v608_v45  ;;  %v609_v55 = vmax.f32 %v555_v46, 0.0  ;;  %v769_v17 = vmax.f32 %v763_v5, 0.0  ;;  %v766_v18 = vadd.f32 %v3184_v36, %v765_v13  ;;  %v2749_v20 = vpop.f32.mrb[3].mxu1 }
  0xf0   : > { %v2578_v57 = vpack.c.bf16 %v606_v49, %v606_v49  ;;  %v607_v58 = vmax.f32 %v547_v50, 0.0  ;;  %v3231_v49 = vrot.slane %v1013_v25, 5  ;;  %v2973_v20 = vld [vmem:[%s3517_s4 + $0x28] sm:$0xff]  }
  0xf1   : > { %689 = vst.msk [vmem:[#allocation2 + $0xc] sm:$0xf] %vm686_vm5, %v2580_v54  ;;  %v2581_v62 = vpack.c.bf16 %v609_v55, %v609_v55  ;;  %v775_v28 = vsel %vm3205_vm6, 0.0, %v769_v17  ;;  %v770_v29 = vmax.f32 %v766_v18, 0.0 }
  0xf2   : > { %687 = vst.msk [vmem:[#allocation2] sm:$0xf] %vm686_vm5, %v2578_v57  ;;  %v2579_v1 = vpack.c.bf16 %v607_v58, %v607_v58  ;;  %v2734_v2 = vpop.f32.mrb[4].mxu0  ;;  %v2594_v33 = vpack.c.bf16 %v775_v28, %v775_v28 }
  0xf3   : > { %690 = vst.msk [vmem:[#allocation2 + $0x10] sm:$0xf] %vm686_vm5, %v2581_v62  ;;  %v568_v8 = vadd.f32 %v2734_v2, %v3184_v36  ;;  %v559_v9 = vpop.f32.mrb[5].mxu0  ;;  %v776_v38 = vsel %vm3205_vm6, 0.0, %v770_v29 }
  0xf4   : > { %688 = vst.msk [vmem:[#allocation2 + $0x4] sm:$0xf] %vm686_vm5, %v2579_v1  ;;  %v560_v14 = vadd.f32 %v3184_v36, %v559_v9  ;;  %v2735_v15 = vpop.f32.mrb[6].mxu0  ;;  %786 = vst.msk [vmem:[#allocation2 + $0x60] sm:$0xf] %vm686_vm5, %v2594_v33  ;;  %v2595_v43 = vpack.c.bf16 %v776_v38, %v776_v38 }
  0xf5   : > { %v612_v21 = vmax.f32 %v568_v8, 0.0  ;;  %v571_v22 = vadd.f32 %v2735_v15, %v3184_v36  ;;  %v562_v23 = vpop.f32.mrb[7].mxu0 }
  0xf6   : > { %v610_v26 = vmax.f32 %v560_v14, 0.0  ;;  %v563_v27 = vadd.f32 %v3184_v36, %v562_v23  ;;  %787 = vst.msk [vmem:[#allocation2 + $0x64] sm:$0xf] %vm686_vm5, %v2595_v43 }
  0xf7   : > { %v2584_v30 = vpack.c.bf16 %v612_v21, %v612_v21  ;;  %v613_v31 = vmax.f32 %v571_v22, 0.0 }
  0xf8   : > { %v2582_v34 = vpack.c.bf16 %v610_v26, %v610_v26  ;;  %v611_v35 = vmax.f32 %v563_v27, 0.0  ;;  %v3222_v37 = vld [vmem:[#allocation2 + $0xc] sm:$0xf] }
  0xf9   : > { %693 = vst.msk [vmem:[#allocation2 + $0x24] sm:$0xf] %vm686_vm5, %v2584_v30  ;;  %v2585_v39 = vpack.c.bf16 %v613_v31, %v613_v31  ;;  %v818_v40 = vld [vmem:[#allocation2] sm:$0xf]  ;;  %v874_v41 = vshrl.u32 %v3222_v37, 16  ;;  %v877_v42 = vshll.u32 %v3222_v37, 16 }
  0xfa   : > { %691 = vst.msk [vmem:[#allocation2 + $0x18] sm:$0xf] %vm686_vm5, %v2582_v34  ;;  %v2583_v44 = vpack.c.bf16 %v611_v35, %v611_v35  ;;  %v2738_v45 = vpop.f32.mrb[8].mxu0  ;;  %v850_v46 = vshrl.u32 %v818_v40, 16  ;;  %v853_v47 = vshll.u32 %v818_v40, 16 }
  0xfb   : > { %v821_v48 = vld [vmem:[#allocation2 + $0x10] sm:$0xf]  ;;  %694 = vst.msk [vmem:[#allocation2 + $0x28] sm:$0xf] %vm686_vm5, %v2585_v39  ;;  %v584_v50 = vadd.f32 %v2738_v45, %v3184_v36  ;;  %v575_v51 = vpop.f32.mrb[9].mxu0  ;;  %v876_v53 = vrot.slane %v874_v41, 4 }
  0xfc   : > { %v819_v52 = vld [vmem:[#allocation2 + $0x4] sm:$0xf]  ;;  %v879_v54 = vrot.slane %v877_v42, 5  ;;  %v883_v55 = vshll.u32 %v821_v48, 16  ;;  %692 = vst.msk [vmem:[#allocation2 + $0x1c] sm:$0xf] %vm686_vm5, %v2583_v44  ;;  %v576_v56 = vadd.f32 %v3184_v36, %v575_v51  ;;  %v2491_v22 = vcombine.low %v3222_v37, %v821_v48 }
  0xfd   : > { %v2739_v57 = vpop.f32.mrb[10].mxu0  ;;  %v852_v58 = vrot.slane %v850_v46, 4  ;;  %v855_v59 = vrot.slane %v853_v47, 5  ;;  %v859_v60 = vshll.u32 %v819_v52, 16  ;;  %v616_v61 = vmax.f32 %v584_v50, 0.0  ;;  %v3271_v45 = vld [vmem:[%s3517_s4 + $0x30] sm:$0xff]  }
  0xfe   : > { %v587_v62 = vadd.f32 %v2739_v57, %v3184_v36  ;;  %v578_v63 = vpop.f32.mrb[11].mxu0  ;;  %v863_v0 = vshrl.u32 %v819_v52, 16  ;;  %v2490_v1 = vcombine.low %v818_v40, %v819_v52  ;;  %v614_v2 = vmax.f32 %v576_v56, 0.0 }
  0xff   : > { %v579_v5 = vadd.f32 %v3184_v36, %v578_v63  ;;  %v3240_v6 = vrot.slane %v859_v60, 5  ;;  %v880_v7 = vor.u32 %v879_v54, %v876_v53  ;;  %v2588_v8 = vpack.c.bf16 %v616_v61, %v616_v61 }
 0x100   : > { %v617_v9 = vmax.f32 %v587_v62, 0.0  ;;  %v865_v11 = vrot.slane %v863_v0, 4  ;;  %2774 = vmatprep.mubr.msk.bf16.mxu1 %vm1081_vm7, %v2490_v1  ;;  %v3243_v12 = vrot.slane %v883_v55, 5  ;;  %v2586_v13 = vpack.c.bf16 %v614_v2, %v614_v2  ;;  %v3247_v18 = vld [vmem:[#allocation2 + $0x24] sm:$0xf] }
 0x101   : > { %v615_v14 = vmax.f32 %v579_v5, 0.0  ;;  %v3245_v15 = vrot.slane %v880_v7, 4  ;;  %v887_v17 = vshrl.u32 %v821_v48, 16  ;;  %697 = vst.msk [vmem:[#allocation2 + $0x3c] sm:$0xf] %vm686_vm5, %v2588_v8  ;;  %v856_v25 = vor.u32 %v855_v59, %v852_v58  ;;  %2775 = vmatmul.mubr.msk.bf16.vlgmr.msra.gmra.mrb[4].mxu1 %vm1081_vm7, %v2491_v22 }
 0x102   : > { %v2589_v21 = vpack.c.bf16 %v617_v9, %v617_v9  ;;  %v822_v23 = vld [vmem:[#allocation2 + $0x18] sm:$0xf]  ;;  %v866_v26 = vor.u32 %v865_v11, %v3240_v6  ;;  %695 = vst.msk [vmem:[#allocation2 + $0x30] sm:$0xf] %vm686_vm5, %v2586_v13  ;;  %v2742_v29 = vpop.f32.mrb[12].mxu0  ;;  %v922_v39 = vshrl.u32 %v3247_v18, 16  ;;  %2791 = vmatpush3.bf16.msra.mxu1 %v3158_v19 }
 0x103   : > { %v2587_v27 = vpack.c.bf16 %v615_v14, %v615_v14  ;;  %v889_v28 = vrot.slane %v887_v17, 4  ;;  %v898_v30 = vshrl.u32 %v822_v23, 16  ;;  %v901_v31 = vshll.u32 %v822_v23, 16  ;;  %v591_v34 = vpop.f32.mrb[13].mxu0  ;;  %v823_v35 = vld [vmem:[#allocation2 + $0x1c] sm:$0xf]  ;;  %2792 = vmatprep.subr.bf16.mxu1 %v2973_v20 }
 0x104   : > { %698 = vst.msk [vmem:[#allocation2 + $0x40] sm:$0xf] %vm686_vm5, %v2589_v21  ;;  %v600_v33 = vadd.f32 %v2742_v29, %v3184_v36  ;;  %v857_v37 = vrot.slane %v856_v25, 4  ;;  %v867_v38 = vrot.slane %v866_v26, 4  ;;  %v592_v41 = vadd.f32 %v3184_v36, %v591_v34  ;;  %v2743_v42 = vpop.f32.mrb[14].mxu0  ;;  %v2990_v19 = vld [vmem:[%s3519_s6 + $0x18] sm:$0xff]  }
 0x105   : > { %696 = vst.msk [vmem:[#allocation2 + $0x34] sm:$0xf] %vm686_vm5, %v2587_v27  ;;  %v890_v40 = vor.u32 %v889_v28, %v3243_v12  ;;  %v3264_v43 = vrot.slane %v898_v30, 4  ;;  %v3266_v44 = vrot.slane %v901_v31, 5  ;;  %v603_v47 = vadd.f32 %v2743_v42, %v3184_v36  ;;  %v594_v48 = vpop.f32.mrb[15].mxu0 }
 0x106   : > { %v620_v46 = vmax.f32 %v600_v33, 0.0  ;;  %v907_v50 = vshll.u32 %v823_v35, 16  ;;  %v911_v51 = vshrl.u32 %v823_v35, 16  ;;  %v618_v53 = vmax.f32 %v592_v41, 0.0  ;;  %v825_v56 = vld [vmem:[#allocation2 + $0x28] sm:$0xf]  ;;  %2793 = vmatpush3.bf16.msra.mxu1 %v2973_v20 }
 0x107   : > { %v891_v52 = vrot.slane %v890_v40, 4  ;;  %v595_v54 = vadd.f32 %v3184_v36, %v594_v48  ;;  %v2492_v55 = vcombine.low %v822_v23, %v823_v35  ;;  %v621_v58 = vmax.f32 %v603_v47, 0.0  ;;  %2810 = vmatprep.subr.bf16.mxu1 %v3271_v45 }
 0x108   : > { %v2592_v57 = vpack.c.bf16 %v620_v46, %v620_v46  ;;  %v3281_v59 = vrot.slane %v907_v50, 5  ;;  %v913_v60 = vrot.slane %v911_v51, 4  ;;  %v2590_v61 = vpack.c.bf16 %v618_v53, %v618_v53  ;;  %v828_v13 = vld [vmem:[#allocation2 + $0x3c] sm:$0xf] }
 0x109   : > { %v619_v62 = vmax.f32 %v595_v54, 0.0  ;;  %2778 = vmatprep.mubr.msk.bf16.mxu1 %vm1081_vm7, %v2492_v55  ;;  %v862_v63 = vsel %vm3276_vm10, %v857_v37, %v3240_v6  ;;  %v872_v0 = vsel %vm3276_vm10, %v867_v38, %v3196_v3  ;;  %v2593_v36 = vpack.c.bf16 %v621_v58, %v621_v58  ;;  %v826_v7 = vld [vmem:[#allocation2 + $0x30] sm:$0xf] }
 0x10a   : > { %701 = vst.msk [vmem:[#allocation2 + $0x54] sm:$0xf] %vm686_vm5, %v2592_v57  ;;  %v2472_v1 = vcombine.low %v862_v63, %v872_v0  ;;  %v924_v2 = vrot.slane %v922_v39, 4  ;;  %v925_v5 = vshll.u32 %v3247_v18, 16  ;;  %699 = vst.msk [vmem:[#allocation2 + $0x48] sm:$0xf] %vm686_vm5, %v2590_v61  ;;  %v2493_v11 = vcombine.low %v3247_v18, %v825_v56 }
 0x10b   : > { %v2591_v8 = vpack.c.bf16 %v619_v62, %v619_v62  ;;  %v931_v9 = vshll.u32 %v825_v56, 16  ;;  %v935_v6 = vshrl.u32 %v825_v56, 16  ;;  %702 = vst.msk [vmem:[#allocation2 + $0x58] sm:$0xf] %vm686_vm5, %v2593_v36  ;;  %v886_v14 = vsel %vm3276_vm10, %v3245_v15, %v3243_v12  ;;  %v829_v26 = vld [vmem:[#allocation2 + $0x40] sm:$0xf] }
 0x10c   : > { %2754 = vmatprep.mubr.msk.bf16.mxu0 %vm1081_vm7, %v2472_v1  ;;  %v927_v3 = vrot.slane %v925_v5, 5  ;;  %v896_v17 = vsel %vm3276_vm10, %v891_v52, %v3198_v4  ;;  %v827_v20 = vld [vmem:[#allocation2 + $0x34] sm:$0xf]  ;;  %v946_v21 = vshrl.u32 %v826_v7, 16  ;;  %2779 = vmatmul.mubr.msk.bf16.gmra.mrb[8].mxu1 %vm1081_vm7, %v2493_v11  ;;  %v949_v25 = vshll.u32 %v826_v7, 16 }
 0x10d   : > { %700 = vst.msk [vmem:[#allocation2 + $0x4c] sm:$0xf] %vm686_vm5, %v2591_v8  ;;  %v933_v18 = vrot.slane %v931_v9, 5  ;;  %v937_v22 = vrot.slane %v935_v6, 4  ;;  %v2473_v23 = vcombine.low %v886_v14, %v896_v17  ;;  %v955_v28 = vshll.u32 %v827_v20, 16 }
 0x10e   : > { %v948_v27 = vrot.slane %v946_v21, 4  ;;  %v959_v29 = vshrl.u32 %v827_v20, 16  ;;  %v2494_v30 = vcombine.low %v826_v7, %v827_v20  ;;  %v951_v12 = vrot.slane %v949_v25, 5 }
 0x10f   : > { %2755 = vmatmul.mubr.msk.bf16.vlgmr.msra.gmra.mrb[16].mxu0 %vm1081_vm7, %v2473_v23  ;;  %v904_v4 = vor.u32 %v3266_v44, %v3264_v43  ;;  %v914_v15 = vor.u32 %v913_v60, %v3281_v59  ;;  %v970_v31 = vshrl.u32 %v828_v13, 16  ;;  %v957_v33 = vrot.slane %v955_v28, 5  ;;  %v845_v23 = vld [vmem:[#allocation2 + $0x5c] sm:$0x1] }
 0x110   : > { %v961_v34 = vrot.slane %v959_v29, 4  ;;  %2782 = vmatprep.mubr.msk.bf16.mxu1 %vm1081_vm7, %v2494_v30  ;;  %v973_v35 = vshll.u32 %v828_v13, 16  ;;  %v979_v37 = vshll.u32 %v829_v26, 16  ;;  %v983_v41 = vshrl.u32 %v829_v26, 16 }
 0x111   : > { %v905_v38 = vrot.slane %v904_v4, 4  ;;  %v915_v39 = vrot.slane %v914_v15, 4  ;;  %v972_v40 = vrot.slane %v970_v31, 4  ;;  %v2495_v47 = vcombine.low %v828_v13, %v829_v26  ;;  %v830_v50 = vld [vmem:[#allocation2 + $0x48] sm:$0xf] }
 0x112   : > { %v975_v42 = vrot.slane %v973_v35, 5  ;;  %v3311_v46 = vrot.slane %v979_v37, 5  ;;  %v928_v48 = vor.u32 %v927_v3, %v924_v2  ;;  %v985_v51 = vrot.slane %v983_v41, 4  ;;  %v832_v53 = vld [vmem:[#allocation2 + $0x54] sm:$0xf] }
 0x113   : > { %v910_v43 = vsel %vm3276_vm10, %v905_v38, %v3281_v59  ;;  %v920_v44 = vsel %vm3276_vm10, %v915_v39, %v3203_v10  ;;  %v938_v52 = vor.u32 %v937_v22, %v933_v18  ;;  %v994_v57 = vshrl.u32 %v830_v50, 16  ;;  %v833_v1 = vld [vmem:[#allocation2 + $0x58] sm:$0xf] }
 0x114   : > { %v2474_v54 = vcombine.low %v910_v43, %v920_v44  ;;  %v929_v55 = vrot.slane %v928_v48, 4  ;;  %v831_v56 = vld [vmem:[#allocation2 + $0x4c] sm:$0xf]  ;;  %v997_v58 = vshll.u32 %v830_v50, 16  ;;  %2783 = vmatmul.mubr.msk.bf16.gmra.mrb[12].mxu1 %vm1081_vm7, %v2495_v47  ;;  %v952_v36 = vor.u32 %v951_v12, %v948_v27  ;;  %v2980_v44 = vld [vmem:[#allocation2 + $0x24] sm:$0xff]  }
 0x115   : > { %v939_v60 = vrot.slane %v938_v52, 4  ;;  %v1003_v61 = vshll.u32 %v831_v56, 16  ;;  %v1007_v62 = vshrl.u32 %v831_v56, 16  ;;  %v2496_v63 = vcombine.low %v830_v50, %v831_v56  ;;  %v2977_v12 = vld [vmem:[#allocation2 + $0xc] sm:$0xff]  }
 0x116   : > { %2758 = vmatprep.mubr.msk.bf16.mxu0 %vm1081_vm7, %v2474_v54  ;;  %v934_v59 = vsel %vm3276_vm10, %v929_v55, %v933_v18  ;;  %v996_v10 = vrot.slane %v994_v57, 4  ;;  %v999_v0 = vrot.slane %v997_v58, 5  ;;  %v962_v8 = vor.u32 %v961_v34, %v957_v33  ;;  %v1586_v54 = vld [vmem:[#allocation2 + $0xc] sm:$0xf]  ;;  %v1590_v57 = vld [vmem:[#allocation2 + $0x1c] sm:$0xf] }
 0x117   : > { %v944_v2 = vsel %vm3276_vm10, %v939_v60, %v3211_v16  ;;  %v1005_v5 = vrot.slane %v1003_v61, 5  ;;  %v1009_v7 = vrot.slane %v1007_v62, 4  ;;  %2786 = vmatprep.mubr.msk.bf16.mxu1 %vm1081_vm7, %v2496_v63  ;;  %v953_v6 = vrot.slane %v952_v36, 4  ;;  %v2981_v58 = vld [vmem:[#allocation2 + $0x30] sm:$0xff]   ;;  %v2982_v62 = vld [vmem:[#allocation2 + $0x3c] sm:$0xff]  }
 0x118   : > { %v2475_v9 = vcombine.low %v934_v59, %v944_v2  ;;  %v1018_v11 = vshrl.u32 %v832_v53, 16  ;;  %v1021_v13 = vshll.u32 %v832_v53, 16  ;;  %v963_v3 = vrot.slane %v962_v8, 4  ;;  %v1589_v63 = vld [vmem:[#allocation2 + $0x18] sm:$0xf] }
 0x119   : > { %v1027_v14 = vshll.u32 %v833_v1, 16  ;;  %v1031_v17 = vshrl.u32 %v833_v1, 16  ;;  %v2497_v20 = vcombine.low %v832_v53, %v833_v1  ;;  %v958_v21 = vsel %vm3276_vm10, %v953_v6, %v957_v33  ;;  %v1592_v1 = vld [vmem:[#allocation2 + $0x24] sm:$0xf]  ;;  %v1593_v2 = vld [vmem:[#allocation2 + $0x28] sm:$0xf] }
 0x11a   : > { %2759 = vmatmul.mubr.msk.bf16.gmra.mrb[20].mxu0 %vm1081_vm7, %v2475_v9  ;;  %v1020_v18 = vrot.slane %v1018_v11, 4  ;;  %v1023_v16 = vrot.slane %v1021_v13, 5  ;;  %v976_v22 = vor.u32 %v975_v42, %v972_v40  ;;  %v968_v25 = vsel %vm3276_vm10, %v963_v3, %v3220_v32  ;;  %v1591_v8 = vld [vmem:[#allocation2 + $0x20] sm:$0x1] }
 0x11b   : > { %v1029_v26 = vrot.slane %v1027_v14, 5  ;;  %v1033_v27 = vrot.slane %v1031_v17, 4  ;;  %v986_v28 = vor.u32 %v985_v51, %v3311_v46  ;;  %v2476_v29 = vcombine.low %v958_v21, %v968_v25 }
 0x11c   : > { %v977_v30 = vrot.slane %v976_v22, 4  ;;  %v1000_v4 = vor.u32 %v999_v0, %v996_v10  ;;  %v1010_v15 = vor.u32 %v1009_v7, %v1005_v5  ;;  %2787 = vmatmul.mubr.msk.bf16.gmra.mrb[16].mxu1 %vm1081_vm7, %v2497_v20  ;;  %v1037_v34 = vshll.u32 %v845_v23, 16  ;;  %v1594_v22 = vld [vmem:[#allocation2 + $0x2c] sm:$0x1] }
 0x11d   : > { %v987_v31 = vrot.slane %v986_v28, 4  ;;  %v1034_v33 = vor.u32 %v1033_v27, %v1029_v26  ;;  %2762 = vmatprep.mubr.msk.bf16.mxu0 %vm1081_vm7, %v2476_v29  ;;  %2794 = vmatprep.mubr.msk.bf16.mxu1 %vm1081_vm7, %v2977_v12  ;;  %v1024_v39 = vor.u32 %v1023_v16, %v1020_v18  ;;  %v1611_v60 = vshrl.u32 %v1586_v54, 16  ;;  %v2984_v23 = vld [vmem:[#allocation2 + $0x48] sm:$0xff]   ;;  %v1596_v28 = vld [vmem:[#allocation2 + $0x34] sm:$0xf] }
 0x11e   : > { %v1001_v35 = vrot.slane %v1000_v4, 4  ;;  %v1011_v32 = vrot.slane %v1010_v15, 4  ;;  %v982_v37 = vsel %vm3276_vm10, %v977_v30, %v3311_v46  ;;  %v1039_v50 = vrot.slane %v1037_v34, 5  ;;  %v2979_v46 = vld [vmem:[#allocation2 + $0x18] sm:$0xff]   ;;  %v1600_v29 = vld [vmem:[#allocation2 + $0x44] sm:$0x1] }
 0x11f   : > { %v992_v38 = vsel %vm3276_vm10, %v987_v31, %v3215_v24  ;;  %v1035_v48 = vrot.slane %v1034_v33, 4  ;;  %v1025_v43 = vrot.slane %v1024_v39, 4  ;;  %v2983_v24 = vld [vmem:[%s3517_s4 + $0x38] sm:$0xff]   ;;  %v1614_v61 = vshll.u32 %v1586_v54, 16  ;;  %v1599_v31 = vld [vmem:[#allocation2 + $0x40] sm:$0xf] }
 0x120   : > { %v2477_v40 = vcombine.low %v982_v37, %v992_v38  ;;  %v1006_v41 = vsel %vm3276_vm10, %v1001_v35, %v1005_v5  ;;  %v1016_v42 = vsel %vm3276_vm10, %v1011_v32, %v3231_v49  ;;  %v1587_v49 = vld [vmem:[#allocation2 + $0x10] sm:$0xf]  ;;  %v1644_v59 = vshll.u32 %v1590_v57, 16  ;;  %v2985_v30 = vld [vmem:[#allocation2 + $0x54] sm:$0xff]  }
 0x121   : > { %v2478_v47 = vcombine.low %v1006_v41, %v1016_v42  ;;  %v1040_v51 = vsel %vm3276_vm10, %v1035_v48, %v1039_v50  ;;  %v1030_v52 = vsel %vm3276_vm10, %v1025_v43, %v1029_v26  ;;  %v1620_v55 = vshll.u32 %v1587_v49, 16  ;;  %v1595_v37 = vld [vmem:[#allocation2 + $0x30] sm:$0xf]  ;;  %v1598_v50 = vld [vmem:[#allocation2 + $0x3c] sm:$0xf] }
 0x122   : > { %2763 = vmatmul.mubr.msk.bf16.gmra.mrb[24].mxu0 %vm1081_vm7, %v2477_v40  ;;  %v2479_v53 = vcombine.low %v1030_v52, %v1040_v51  ;;  %v1624_v56 = vshrl.u32 %v1587_v49, 16  ;;  %v1648_v36 = vshrl.u32 %v1590_v57, 16  ;;  %v1613_v5 = vrot.slane %v1611_v60, 4  ;;  %v1597_v40 = vld [vmem:[#allocation2 + $0x38] sm:$0x1] }
 0x123   : > { %2766 = vmatprep.mubr.msk.bf16.mxu0 %vm1081_vm7, %v2478_v47  ;;  %v3362_v10 = vrot.slane %v1620_v55, 5  ;;  %v1616_v7 = vrot.slane %v1614_v61, 5  ;;  %v1635_v9 = vshrl.u32 %v1589_v63, 16  ;;  %v1638_v6 = vshll.u32 %v1589_v63, 16  ;;  %v2986_v61 = vld [vmem:[#allocation2 + $0x60] sm:$0xff]  }
 0x124   : > { %2795 = vmatmul.mubr.msk.bf16.vlgmr.msra.gmra.mrb[4].mxu1 %vm1081_vm7, %v2979_v46  ;;  %v1626_v0 = vrot.slane %v1624_v56, 4  ;;  %v3365_v13 = vrot.slane %v1644_v59, 5  ;;  %v1659_v3 = vshrl.u32 %v1592_v1, 16  ;;  %v1662_v14 = vshll.u32 %v1592_v1, 16 }
 0x125   : > { %2811 = vmatpush3.bf16.msra.mxu1 %v3271_v45  ;;  %2798 = vmatprep.mubr.msk.bf16.mxu1 %vm1081_vm7, %v2980_v44  ;;  %v1588_v45 = vld [vmem:[#allocation2 + $0x14] sm:$0x1]  ;;  %v1650_v20 = vrot.slane %v1648_v36, 4  ;;  %v1668_v21 = vshll.u32 %v1593_v2, 16  ;;  %v1672_v18 = vshrl.u32 %v1593_v2, 16  ;;  %v1654_v16 = vshll.u32 %v1591_v8, 16 }
 0x126   : > { %2812 = vmatprep.subr.bf16.mxu1 %v2983_v24  ;;  %v1630_v11 = vshll.u32 %v1588_v45, 16  ;;  %v1627_v17 = vor.u32 %v1626_v0, %v3362_v10  ;;  %v1617_v25 = vor.u32 %v1616_v7, %v1613_v5  ;;  %v1637_v26 = vrot.slane %v1635_v9, 4  ;;  %v1602_v5 = vld [vmem:[#allocation2 + $0x4c] sm:$0xf] }
 0x127   : > { %v1640_v27 = vrot.slane %v1638_v6, 5  ;;  %v1661_v4 = vrot.slane %v1659_v3, 4  ;;  %v1664_v15 = vrot.slane %v1662_v14, 5  ;;  %v1651_v34 = vor.u32 %v1650_v20, %v3365_v13  ;;  %v1601_v14 = vld [vmem:[#allocation2 + $0x48] sm:$0xf] }
 0x128   : > { %v1632_v12 = vrot.slane %v1630_v11, 5  ;;  %v1628_v33 = vrot.slane %v1627_v17, 4  ;;  %v3370_v35 = vrot.slane %v1668_v21, 5  ;;  %v1674_v32 = vrot.slane %v1672_v18, 4  ;;  %v1605_v17 = vld [vmem:[#allocation2 + $0x58] sm:$0xf] }
 0x129   : > { %2813 = vmatpush3.bf16.msra.mxu1 %v2983_v24  ;;  %v1656_v38 = vrot.slane %v1654_v16, 5  ;;  %v1678_v39 = vshll.u32 %v1594_v22, 16  ;;  %v1692_v41 = vshll.u32 %v1596_v28, 16  ;;  %v1696_v42 = vshrl.u32 %v1596_v28, 16  ;;  %v1604_v22 = vld [vmem:[#allocation2 + $0x54] sm:$0xf] }
 0x12a   : > { %2767 = vmatmul.mubr.msk.bf16.gmra.mrb[28].mxu0 %vm1081_vm7, %v2479_v53  ;;  %v1618_v47 = vrot.slane %v1617_v25, 4  ;;  %v1641_v48 = vor.u32 %v1640_v27, %v1637_v26  ;;  %v1716_v46 = vshll.u32 %v1599_v31, 16  ;;  %v1720_v43 = vshrl.u32 %v1599_v31, 16 }
 0x12b   : > { %v1665_v24 = vor.u32 %v1664_v15, %v1661_v4  ;;  %v1683_v44 = vshrl.u32 %v1595_v37, 16  ;;  %v1686_v51 = vshll.u32 %v1595_v37, 16  ;;  %v1726_v49 = vshll.u32 %v1600_v29, 16  ;;  %v1603_v15 = vld [vmem:[#allocation2 + $0x50] sm:$0x1] }
 0x12c   : > { %2799 = vmatmul.mubr.msk.bf16.gmra.mrb[8].mxu1 %vm1081_vm7, %v2981_v58  ;;  %v1633_v52 = vsel %vm3276_vm10, %v1628_v33, %v1632_v12  ;;  %v1652_v53 = vrot.slane %v1651_v34, 4  ;;  %v1675_v54 = vor.u32 %v1674_v32, %v3370_v35  ;;  %v1702_v55 = vshll.u32 %v1597_v40, 16  ;;  %v1607_v40 = vld [vmem:[#allocation2 + $0x60] sm:$0xf] }
 0x12d   : > { %2802 = vmatprep.mubr.msk.bf16.mxu1 %vm1081_vm7, %v2982_v62  ;;  %v3376_v56 = vrot.slane %v1692_v41, 5  ;;  %v1698_v57 = vrot.slane %v1696_v42, 4  ;;  %v1707_v58 = vshrl.u32 %v1598_v50, 16  ;;  %v1710_v60 = vshll.u32 %v1598_v50, 16 }
 0x12e   : > { %v1623_v62 = vsel %vm3276_vm10, %v1618_v47, %v3362_v10  ;;  %v1642_v45 = vrot.slane %v1641_v48, 4  ;;  %v3381_v63 = vrot.slane %v1716_v46, 5  ;;  %v1722_v59 = vrot.slane %v1720_v43, 4  ;;  %v1608_v48 = vld [vmem:[#allocation2 + $0x64] sm:$0xf] }
 0x12f   : > { %v2526_v0 = vcombine.low %v1623_v62, %v1633_v52  ;;  %v1666_v36 = vrot.slane %v1665_v24, 4  ;;  %v1685_v1 = vrot.slane %v1683_v44, 4  ;;  %v1688_v2 = vrot.slane %v1686_v51, 5  ;;  %v1606_v44 = vld [vmem:[#allocation2 + $0x5c] sm:$0x1] }
 0x130   : > { %v1657_v7 = vsel %vm3276_vm10, %v1652_v53, %v1656_v38  ;;  %v1676_v8 = vrot.slane %v1675_v54, 4  ;;  %v1680_v9 = vrot.slane %v1678_v39, 5  ;;  %v1728_v6 = vrot.slane %v1726_v49, 5 }
 0x131   : > { %v1699_v10 = vor.u32 %v1698_v57, %v3376_v56  ;;  %v1709_v11 = vrot.slane %v1707_v58, 4  ;;  %v1712_v3 = vrot.slane %v1710_v60, 5  ;;  %v1647_v20 = vsel %vm3276_vm10, %v1642_v45, %v3365_v13 }
 0x132   : > { %v1723_v21 = vor.u32 %v1722_v59, %v3381_v63  ;;  %v1740_v18 = vshll.u32 %v1602_v5, 16  ;;  %v1744_v16 = vshrl.u32 %v1602_v5, 16  ;;  %v1671_v25 = vsel %vm3276_vm10, %v1666_v36, %v3370_v35 }
 0x133   : > { %v1689_v26 = vor.u32 %v1688_v2, %v1685_v1  ;;  %v1704_v27 = vrot.slane %v1702_v55, 5  ;;  %v1681_v28 = vsel %vm3276_vm10, %v1676_v8, %v1680_v9  ;;  %v1731_v29 = vshrl.u32 %v1601_v14, 16 }
 0x134   : > { %2803 = vmatmul.mubr.msk.bf16.gmra.mrb[12].mxu1 %vm1081_vm7, %v2984_v23  ;;  %v2527_v23 = vcombine.low %v1647_v20, %v1657_v7  ;;  %v1768_v12 = vshrl.u32 %v1605_v17, 16  ;;  %v1700_v4 = vrot.slane %v1699_v10, 4  ;;  %v1713_v13 = vor.u32 %v1712_v3, %v1709_v11  ;;  %v1609_v3 = vld [vmem:[#allocation2 + $0x68] sm:$0x1] }
 0x135   : > { %2806 = vmatprep.mubr.msk.bf16.mxu1 %vm1081_vm7, %v2985_v30  ;;  %v1764_v30 = vshll.u32 %v1605_v17, 16  ;;  %v1734_v31 = vshll.u32 %v1601_v14, 16  ;;  %v1755_v33 = vshrl.u32 %v1604_v22, 16  ;;  %v1724_v34 = vrot.slane %v1723_v21, 4 }
 0x136   : > { %v1742_v32 = vrot.slane %v1740_v18, 5  ;;  %v1746_v37 = vrot.slane %v1744_v16, 4  ;;  %v1758_v38 = vshll.u32 %v1604_v22, 16  ;;  %v2528_v39 = vcombine.low %v1671_v25, %v1681_v28 }
 0x137   : > { %v1690_v35 = vrot.slane %v1689_v26, 4  ;;  %v1750_v41 = vshll.u32 %v1603_v15, 16  ;;  %v1766_v42 = vrot.slane %v1764_v30, 5  ;;  %v1770_v47 = vrot.slane %v1768_v12, 4  ;;  %v2989_v15 = vld [vmem:[%s3519_s6 + $0x10] sm:$0xff]  }
 0x138   : > { %v1705_v50 = vsel %vm3276_vm10, %v1700_v4, %v1704_v27  ;;  %v1714_v46 = vrot.slane %v1713_v13, 4  ;;  %v1733_v43 = vrot.slane %v1731_v29, 4  ;;  %v1736_v24 = vrot.slane %v1734_v31, 5  ;;  %v2987_v4 = vld [vmem:[%s3519_s6] sm:$0xff]   ;;  %v2988_v13 = vld [vmem:[%s3519_s6 + $0x8] sm:$0xff]  }
 0x139   : > { %v1729_v51 = vsel %vm3276_vm10, %v1724_v34, %v1728_v6  ;;  %v1747_v49 = vor.u32 %v1746_v37, %v1742_v32  ;;  %v1757_v52 = vrot.slane %v1755_v33, 4  ;;  %v1760_v53 = vrot.slane %v1758_v38, 5  ;;  %2830 = vmatprep.subr.bf16.mxu0 %v2987_v4  ;;  %v2991_v31 = vld [vmem:[%s3519_s6 + $0x20] sm:$0xff]   ;;  %v2992_v33 = vld [vmem:[%s3519_s6 + $0x28] sm:$0xff]   ;;  %v2993_v34 = vld [vmem:[%s3519_s6 + $0x30] sm:$0xff]  }
 0x13a   : > { %v1779_v54 = vshrl.u32 %v1607_v40, 16  ;;  %v1782_v55 = vshll.u32 %v1607_v40, 16  ;;  %v1788_v57 = vshll.u32 %v1608_v48, 16  ;;  %v1792_v58 = vshrl.u32 %v1608_v48, 16  ;;  %2831 = vmatpush3.bf16.msra.mxu0 %v2987_v4 }
 0x13b   : > { %v1771_v60 = vor.u32 %v1770_v47, %v1766_v42  ;;  %v1695_v62 = vsel %vm3276_vm10, %v1690_v35, %v3376_v56  ;;  %v1719_v45 = vsel %vm3276_vm10, %v1714_v46, %v3381_v63  ;;  %v1737_v59 = vor.u32 %v1736_v24, %v1733_v43  ;;  %2832 = vmatprep.subr.bf16.mxu0 %v2988_v13 }
 0x13c   : > { %2807 = vmatmul.mubr.msk.bf16.gmra.mrb[16].mxu1 %vm1081_vm7, %v2986_v61  ;;  %v1774_v61 = vshll.u32 %v1606_v44, 16  ;;  %v2529_v36 = vcombine.low %v1695_v62, %v1705_v50  ;;  %v2530_v1 = vcombine.low %v1719_v45, %v1729_v51  ;;  %v1748_v2 = vrot.slane %v1747_v49, 4 }
 0x13d   : > { %2814 = vmatprep.mubr.msk.bf16.mxu1 %vm1081_vm7, %v2526_v0  ;;  %v1752_v0 = vrot.slane %v1750_v41, 5  ;;  %v1761_v5 = vor.u32 %v1760_v53, %v1757_v52  ;;  %v1781_v7 = vrot.slane %v1779_v54, 4  ;;  %v1784_v8 = vrot.slane %v1782_v55, 5  ;;  %v3459_v53 = vld [vmem:[%s3518_s5] ss:$0 sm:$0xff] }
 0x13e   : > { %v1790_v9 = vrot.slane %v1788_v57, 5  ;;  %v1794_v6 = vrot.slane %v1792_v58, 4  ;;  %v1772_v10 = vrot.slane %v1771_v60, 4  ;;  %v1776_v11 = vrot.slane %v1774_v61, 5  ;;  %2833 = vmatpush3.bf16.msra.mxu0 %v2988_v13 }
 0x13f   : > { %v1738_v56 = vrot.slane %v1737_v59, 4  ;;  %v1762_v14 = vrot.slane %v1761_v5, 4  ;;  %v1753_v63 = vsel %vm3276_vm10, %v1748_v2, %v1752_v0  ;;  %v1785_v17 = vor.u32 %v1784_v8, %v1781_v7  ;;  %2834 = vmatprep.subr.bf16.mxu0 %v2989_v15 }
 0x140   : > { %v1795_v20 = vor.u32 %v1794_v6, %v1790_v9  ;;  %v1798_v21 = vshll.u32 %v1609_v3, 16  ;;  %v1777_v18 = vsel %vm3276_vm10, %v1772_v10, %v1776_v11 }
 0x141   : > { %v1743_v16 = vsel %vm3276_vm10, %v1738_v56, %v1742_v32  ;;  %v1786_v26 = vrot.slane %v1785_v17, 4  ;;  %v2994_v32 = vld [vmem:[%s3519_s6 + $0x38] sm:$0xff]  }
 0x142   : > { %v2531_v22 = vcombine.low %v1743_v16, %v1753_v63  ;;  %v1796_v27 = vrot.slane %v1795_v20, 4  ;;  %v1800_v28 = vrot.slane %v1798_v21, 5  ;;  %2835 = vmatpush3.bf16.msra.mxu0 %v2989_v15 }
 0x143   : > { %v1791_v29 = vsel %vm3276_vm10, %v1786_v26, %v1790_v9  ;;  %2836 = vmatprep.subr.bf16.mxu0 %v2990_v19 }
 0x144   : > { %2815 = vmatmul.mubr.msk.bf16.vlgmr.msra.gmra.mrb[4].mxu1 %vm1081_vm7, %v2527_v23  ;;  %v1767_v23 = vsel %vm3276_vm10, %v1762_v14, %v1766_v42  ;;  %v1801_v30 = vsel %vm3276_vm10, %v1796_v27, %v1800_v28 }
 0x145   : > { %2818 = vmatprep.mubr.msk.bf16.mxu1 %vm1081_vm7, %v2528_v39  ;;  %v2532_v25 = vcombine.low %v1767_v23, %v1777_v18  ;;  %v2533_v12 = vcombine.low %v1791_v29, %v1801_v30 }
 0x146   : > { %2837 = vmatpush3.bf16.msra.mxu0 %v2990_v19 }
 0x147   : > { %2838 = vmatprep.subr.bf16.mxu0 %v2991_v31 }
 0x14a   : > { %2839 = vmatpush3.bf16.msra.mxu0 %v2991_v31 }
 0x14b   : > { %2840 = vmatprep.subr.bf16.mxu0 %v2992_v33 }
 0x14c   : > { %2819 = vmatmul.mubr.msk.bf16.gmra.mrb[8].mxu1 %vm1081_vm7, %v2529_v36 }
 0x14d   : > { %2822 = vmatprep.mubr.msk.bf16.mxu1 %vm1081_vm7, %v2530_v1 }
 0x14e   : > { %2841 = vmatpush3.bf16.msra.mxu0 %v2992_v33 }
 0x14f   : > { %2842 = vmatprep.subr.bf16.mxu0 %v2993_v34 }
 0x152   : > { %2843 = vmatpush3.bf16.msra.mxu0 %v2993_v34 }
 0x153   : > { %2844 = vmatprep.subr.bf16.mxu0 %v2994_v32 }
 0x154   : > { %2823 = vmatmul.mubr.msk.bf16.gmra.mrb[12].mxu1 %vm1081_vm7, %v2531_v22 }
 0x155   : > { %2826 = vmatprep.mubr.msk.bf16.mxu1 %vm1081_vm7, %v2532_v25 }
 0x156   : > { %2845 = vmatpush3.bf16.msra.mxu0 %v2994_v32 }
 0x15c   : > { %2827 = vmatmul.mubr.msk.bf16.gmra.mrb[16].mxu1 %vm1081_vm7, %v2533_v12 }
 0x1e2   : > { %v2756_v37 = vpop.f32.mrb[16].mxu0 }
 0x1e3   : > { %v1140_v38 = vpop.f32.mrb[17].mxu0 }
 0x1e4   : > { %v2757_v39 = vpop.f32.mrb[18].mxu0 }
 0x1e5   : > { %v1143_v40 = vpop.f32.mrb[19].mxu0 }
 0x1ed   : > { %v2760_v35 = vpop.f32.mrb[20].mxu0 }
 0x1ee   : > { %v1156_v41 = vpop.f32.mrb[21].mxu0 }
 0x1ef   : > { %v2761_v42 = vpop.f32.mrb[22].mxu0 }
 0x1f0   : > { %v1159_v47 = vpop.f32.mrb[23].mxu0 }
 0x1f5   : > { %v2764_v48 = vpop.f32.mrb[24].mxu0 }
 0x1f6   : > { %v1172_v50 = vpop.f32.mrb[25].mxu0 }
 0x1f7   : > { %v2765_v46 = vpop.f32.mrb[26].mxu0 }
 0x1f8   : > { %v1175_v43 = vpop.f32.mrb[27].mxu0 }
 0x1fd   : > { %v2768_v24 = vpop.f32.mrb[28].mxu0 }
 0x1fe   : > { %v3450_v44 = vpop.f32.mrb[29].mxu0 }
 0x1ff   : > { %v3452_v51 = vpop.f32.mrb[30].mxu0 }
 0x200   : > { %v3454_v49 = vpop.f32.mrb[31].mxu0 }
 0x217   : > { %v2816_v52 = vpop.f32.mrb[4].mxu1 }
 0x218   : > { %v2862_v54 = vadd.f32 %v2816_v52, %v2756_v37  ;;  %v1900_v55 = vpop.f32.mrb[5].mxu1 }
 0x219   : > { %v2863_v57 = vadd.f32 %v1900_v55, %v1140_v38  ;;  %v2817_v58 = vpop.f32.mrb[6].mxu1 }
 0x21a   : > { %v1988_v60 = vadd.f32 %v2862_v54, %v3459_v53  ;;  %v2864_v61 = vadd.f32 %v2817_v58, %v2757_v39  ;;  %v1903_v62 = vpop.f32.mrb[7].mxu1 }
 0x21b   : > { %v1986_v45 = vadd.f32 %v2863_v57, %v3459_v53  ;;  %v2865_v59 = vadd.f32 %v1903_v62, %v1143_v40 }
 0x21c   : > { %v1989_v0 = vadd.f32 %v2864_v61, %v3459_v53  ;;  %v2004_v1 = vmax.f32 %v1988_v60, 0.0 }
 0x21d   : > { %v1987_v36 = vadd.f32 %v2865_v59, %v3459_v53  ;;  %v2002_v5 = vmax.f32 %v1986_v45, 0.0 }
 0x21e   : > { %v2005_v2 = vmax.f32 %v1989_v0, 0.0 }
 0x21f   : > { %v2003_v7 = vmax.f32 %v1987_v36, 0.0  ;;  %v2820_v8 = vpop.f32.mrb[8].mxu1 }
 0x220   : > { %v2019_v9 = vpack.c.bf16 %v2005_v2, %v2004_v1  ;;  %v2866_v6 = vadd.f32 %v2820_v8, %v2760_v35  ;;  %v1916_v10 = vpop.f32.mrb[9].mxu1 }
 0x221   : > { %v2867_v11 = vadd.f32 %v1916_v10, %v1156_v41  ;;  %v2821_v3 = vpop.f32.mrb[10].mxu1  ;;  %v2018_v56 = vpack.c.bf16 %v2003_v7, %v2002_v5 }
 0x222   : > { %v1992_v14 = vadd.f32 %v2866_v6, %v3459_v53  ;;  %v2868_v63 = vadd.f32 %v2821_v3, %v2761_v42  ;;  %v1919_v17 = vpop.f32.mrb[11].mxu1 }
 0x223   : > { %v1990_v20 = vadd.f32 %v2867_v11, %v3459_v53  ;;  %v2869_v21 = vadd.f32 %v1919_v17, %v1159_v47  ;;  %2846 = vmatprep.mubr.bf16.mxu0 %v2018_v56 }
 0x224   : > { %v1993_v18 = vadd.f32 %v2868_v63, %v3459_v53  ;;  %2847 = vmatmul.mubr.bf16.vlgmr.msra.gmra.mrb[32].mxu0 %v2019_v9  ;;  %v2008_v22 = vmax.f32 %v1992_v14, 0.0 }
 0x225   : > { %v1991_v16 = vadd.f32 %v2869_v21, %v3459_v53  ;;  %v2006_v25 = vmax.f32 %v1990_v20, 0.0 }
 0x226   : > { %v2009_v23 = vmax.f32 %v1993_v18, 0.0 }
 0x227   : > { %v2007_v26 = vmax.f32 %v1991_v16, 0.0  ;;  %v2824_v27 = vpop.f32.mrb[12].mxu1 }
 0x228   : > { %v2870_v28 = vadd.f32 %v2824_v27, %v2764_v48  ;;  %v1932_v29 = vpop.f32.mrb[13].mxu1  ;;  %v2021_v30 = vpack.c.bf16 %v2009_v23, %v2008_v22 }
 0x229   : > { %v2871_v12 = vadd.f32 %v1932_v29, %v1172_v50  ;;  %v2825_v4 = vpop.f32.mrb[14].mxu1  ;;  %v2020_v13 = vpack.c.bf16 %v2007_v26, %v2006_v25 }
 0x22a   : > { %v1996_v15 = vadd.f32 %v2870_v28, %v3459_v53  ;;  %v2872_v19 = vadd.f32 %v2825_v4, %v2765_v46  ;;  %v1935_v31 = vpop.f32.mrb[15].mxu1 }
 0x22b   : > { %v1994_v33 = vadd.f32 %v2871_v12, %v3459_v53  ;;  %v2873_v34 = vadd.f32 %v1935_v31, %v1175_v43  ;;  %2850 = vmatprep.mubr.bf16.mxu0 %v2020_v13 }
 0x22c   : > { %v1997_v32 = vadd.f32 %v2872_v19, %v3459_v53  ;;  %2851 = vmatmul.mubr.bf16.gmra.mrb[36].mxu0 %v2021_v30  ;;  %v2012_v38 = vmax.f32 %v1996_v15, 0.0 }
 0x22d   : > { %v1995_v37 = vadd.f32 %v2873_v34, %v3459_v53  ;;  %v2010_v40 = vmax.f32 %v1994_v33, 0.0 }
 0x22e   : > { %v2013_v39 = vmax.f32 %v1997_v32, 0.0 }
 0x22f   : > { %v2011_v35 = vmax.f32 %v1995_v37, 0.0  ;;  %v2828_v41 = vpop.f32.mrb[16].mxu1 }
 0x230   : > { %v2874_v42 = vadd.f32 %v2828_v41, %v2768_v24  ;;  %v1948_v47 = vpop.f32.mrb[17].mxu1  ;;  %v2023_v48 = vpack.c.bf16 %v2013_v39, %v2012_v38 }
 0x231   : > { %v2875_v50 = vadd.f32 %v1948_v47, %v3450_v44  ;;  %v2829_v46 = vpop.f32.mrb[18].mxu1  ;;  %v2022_v52 = vpack.c.bf16 %v2011_v35, %v2010_v40 }
 0x232   : > { %v2000_v43 = vadd.f32 %v2874_v42, %v3459_v53  ;;  %v2876_v54 = vadd.f32 %v2829_v46, %v3452_v51  ;;  %v1951_v55 = vpop.f32.mrb[19].mxu1  ;;  %v2545_v51 = vld [vmem:[%s3520_s7] ss:$0 sm:$0xff] }
 0x233   : > { %v1998_v57 = vadd.f32 %v2875_v50, %v3459_v53  ;;  %v2877_v58 = vadd.f32 %v1951_v55, %v3454_v49  ;;  %2854 = vmatprep.mubr.bf16.mxu0 %v2022_v52 }
 0x234   : > { %v2001_v60 = vadd.f32 %v2876_v54, %v3459_v53  ;;  %2855 = vmatmul.mubr.bf16.gmra.mrb[40].mxu0 %v2023_v48  ;;  %v2016_v61 = vmax.f32 %v2000_v43, 0.0 }
 0x235   : > { %v1999_v24 = vadd.f32 %v2877_v58, %v3459_v53  ;;  %v2014_v44 = vmax.f32 %v1998_v57, 0.0 }
 0x236   : > { %v2017_v62 = vmax.f32 %v2001_v60, 0.0 }
 0x237   : > { %v2015_v45 = vmax.f32 %v1999_v24, 0.0 }
 0x238   : > { %v2025_v59 = vpack.c.bf16 %v2017_v62, %v2016_v61 }
 0x239   : > { %v2024_v0 = vpack.c.bf16 %v2015_v45, %v2014_v44 }
 0x23b   : > { %2858 = vmatprep.mubr.bf16.mxu0 %v2024_v0 }
 0x23c   : > { %2859 = vmatmul.mubr.bf16.gmra.mrb[44].mxu0 %v2025_v59 }
 0x2f7   : > { %v2848_v49 = vpop.f32.mrb[32].mxu0 }
 0x2f8   : > { %v2140_v36 = vadd.f32 %v2848_v49, %v2545_v51  ;;  %v2131_v1 = vpop.f32.mrb[33].mxu0 }
 0x2f9   : > { %v2132_v2 = vadd.f32 %v2545_v51, %v2131_v1  ;;  %v2849_v5 = vpop.f32.mrb[34].mxu0 }
 0x2fa   : > { %v2143_v7 = vadd.f32 %v2849_v5, %v2545_v51  ;;  %v2134_v53 = vpop.f32.mrb[35].mxu0  ;;  %v2196_v9 = vmax.f32 %v2140_v36, 0.0 }
 0x2fb   : > { %v2135_v8 = vadd.f32 %v2545_v51, %v2134_v53  ;;  %v2194_v10 = vmax.f32 %v2132_v2, 0.0 }
 0x2fc   : > { %v2197_v6 = vmax.f32 %v2143_v7, 0.0 }
 0x2fd   : > { %v2195_v11 = vmax.f32 %v2135_v8, 0.0 }
 0x2fe   : > { %v2620_v3 = vpack.c.bf16 %v2197_v6, %v2196_v9 }
 0x2ff   : > { %v2615_v56 = vpack.c.bf16 %v2195_v11, %v2194_v10  ;;  %v2852_v14 = vpop.f32.mrb[36].mxu0 }
 0x300   : > { %2652 = vst [vmem:[%s3488_s12 + $0x8] sm:$0xff] %v2620_v3   ;;  %v2156_v63 = vadd.f32 %v2852_v14, %v2545_v51  ;;  %v2147_v17 = vpop.f32.mrb[37].mxu0 }
 0x301   : > { %2616 = vst [vmem:[%s3488_s12] sm:$0xff] %v2615_v56   ;;  %v2148_v20 = vadd.f32 %v2545_v51, %v2147_v17  ;;  %v2853_v21 = vpop.f32.mrb[38].mxu0 }
 0x302   : > { %v2159_v18 = vadd.f32 %v2853_v21, %v2545_v51  ;;  %v2150_v16 = vpop.f32.mrb[39].mxu0  ;;  %v2200_v23 = vmax.f32 %v2156_v63, 0.0 }
 0x303   : > { %v2151_v22 = vadd.f32 %v2545_v51, %v2150_v16  ;;  %v2198_v26 = vmax.f32 %v2148_v20, 0.0 }
 0x304   : > { %v2201_v25 = vmax.f32 %v2159_v18, 0.0 }
 0x305   : > { %v2199_v27 = vmax.f32 %v2151_v22, 0.0 }
 0x306   : > { %v2630_v28 = vpack.c.bf16 %v2201_v25, %v2200_v23 }
 0x307   : > { %v2625_v29 = vpack.c.bf16 %v2199_v27, %v2198_v26  ;;  %v2856_v30 = vpop.f32.mrb[40].mxu0 }
 0x308   : > { %2654 = vst [vmem:[%s3488_s12 + $0x18] sm:$0xff] %v2630_v28   ;;  %v2172_v12 = vadd.f32 %v2856_v30, %v2545_v51  ;;  %v2163_v4 = vpop.f32.mrb[41].mxu0 }
 0x309   : > { %2653 = vst [vmem:[%s3488_s12 + $0x10] sm:$0xff] %v2625_v29   ;;  %v2164_v13 = vadd.f32 %v2545_v51, %v2163_v4  ;;  %v2857_v15 = vpop.f32.mrb[42].mxu0 }
 0x30a   : > { %v2175_v19 = vadd.f32 %v2857_v15, %v2545_v51  ;;  %v2166_v31 = vpop.f32.mrb[43].mxu0  ;;  %v2204_v34 = vmax.f32 %v2172_v12, 0.0 }
 0x30b   : > { %v2167_v33 = vadd.f32 %v2545_v51, %v2166_v31  ;;  %v2202_v37 = vmax.f32 %v2164_v13, 0.0 }
 0x30c   : > { %v2205_v32 = vmax.f32 %v2175_v19, 0.0 }
 0x30d   : > { %v2203_v38 = vmax.f32 %v2167_v33, 0.0 }
 0x30e   : > { %v2640_v39 = vpack.c.bf16 %v2205_v32, %v2204_v34 }
 0x30f   : > { %v2635_v40 = vpack.c.bf16 %v2203_v38, %v2202_v37  ;;  %v2860_v35 = vpop.f32.mrb[44].mxu0 }
 0x310   : > { %2656 = vst [vmem:[%s3488_s12 + $0x28] sm:$0xff] %v2640_v39   ;;  %v2188_v41 = vadd.f32 %v2860_v35, %v2545_v51  ;;  %v2179_v42 = vpop.f32.mrb[45].mxu0 }
 0x311   : > { %2655 = vst [vmem:[%s3488_s12 + $0x20] sm:$0xff] %v2635_v40   ;;  %v2180_v47 = vadd.f32 %v2545_v51, %v2179_v42  ;;  %v2861_v48 = vpop.f32.mrb[46].mxu0 }
 0x312   : > { %v2191_v50 = vadd.f32 %v2861_v48, %v2545_v51  ;;  %v2182_v46 = vpop.f32.mrb[47].mxu0  ;;  %v2208_v43 = vmax.f32 %v2188_v41, 0.0 }
 0x313   : > { %v2183_v52 = vadd.f32 %v2545_v51, %v2182_v46  ;;  %v2206_v55 = vmax.f32 %v2180_v47, 0.0 }
 0x314   : > { %v2209_v54 = vmax.f32 %v2191_v50, 0.0 }
 0x315   : > { %v2207_v57 = vmax.f32 %v2183_v52, 0.0 }
 0x316   : > { %v2650_v58 = vpack.c.bf16 %v2209_v54, %v2208_v43 }
 0x317   : > { %v2645_v60 = vpack.c.bf16 %v2207_v57, %v2206_v55 }
 0x318   : > { %2658 = vst [vmem:[%s3488_s12 + $0x38] sm:$0xff] %v2650_v58  }
 0x319   : > { %2657 = vst [vmem:[%s3488_s12 + $0x30] sm:$0xff] %v2645_v60  }
 0x31a PF: > { %s18_s9 = sadd.s32 1, %s3033_s9   ;;  %s3528_s27 = smov %s3025_s29 }
 0x31b   : > { %p15_p9 = scmp.ge.s32.totalorder %s18_s9, 6   ;;  %s3529_s28 = smov %s3029_s30 }
 0x31c   : > { %s3530_s29 = smov %s3533_s10  ;;  %s3531_s30 = smov %s3537_s11 }
 0x31d   :  { %17 = sbr.rel (!%p15_p9) target bundleno = 3 (0x3), region = 87 }

</bundles_post_ra>
